<compile_context>
chip_gen: v7x
topology: tpu7x:2x2x1
jax: 0.10.0
libtpu: 0.0.40
codegen_flags: <defaults>
</compile_context>

<pallas_src>
import math

import jax
import jax.numpy as jnp
from jax import lax
from jax.experimental import pallas as pl
from jax.experimental.pallas import tpu as pltpu


# ----------------------------------------------------------------------------
# Pallas kernels: matmul with fused bias + (ReLU  |  s0*out + s1*skip) epilogue
# ----------------------------------------------------------------------------

def _mm_bias_relu_kernel(p_ref, w_ref, b_ref, o_ref):
    acc = jnp.dot(p_ref[...], w_ref[...], preferred_element_type=jnp.float32)
    acc = acc + b_ref[...]                      # (1, Cout) broadcast over rows
    o_ref[...] = jnp.maximum(acc, 0.0).astype(o_ref.dtype)


def _mm_bias_scale_add_kernel(scale_ref, p_ref, w_ref, b_ref, skip_ref, o_ref):
    # scale_ref: SMEM float32 (2,) = [res_scale, skip_scale]; cast-free f32 math.
    acc = jnp.dot(p_ref[...], w_ref[...], preferred_element_type=jnp.float32)
    acc = acc + b_ref[...]
    res = scale_ref[0] * acc + scale_ref[1] * skip_ref[...].astype(jnp.float32)
    o_ref[...] = res.astype(o_ref.dtype)


def _row_tile(m):
    # Biggest row tile without any wrapper-side padding: whole extent when it
    # fits, otherwise 2048-row blocks (ragged tail handled by Pallas masking).
    return m if m <= 2048 else 2048


def _matmul_bias_relu(patches, wmat, bias):
    m, kc = patches.shape
    cout = wmat.shape[1]
    tile_m = _row_tile(m)
    return pl.pallas_call(
        _mm_bias_relu_kernel,
        out_shape=jax.ShapeDtypeStruct((m, cout), patches.dtype),
        grid_spec=pltpu.PrefetchScalarGridSpec(
            num_scalar_prefetch=0,
            grid=(pl.cdiv(m, tile_m),),
            in_specs=[
                pl.BlockSpec((tile_m, kc), lambda i: (i, 0)),   # patches
                pl.BlockSpec((kc, cout), lambda i: (0, 0)),     # weight (resident)
                pl.BlockSpec((1, cout), lambda i: (0, 0)),      # bias   (resident)
            ],
            out_specs=pl.BlockSpec((tile_m, cout), lambda i: (i, 0)),
        ),
        compiler_params=pltpu.CompilerParams(
            dimension_semantics=("parallel",)),
    )(patches, wmat, bias.reshape(1, cout))


def _matmul_bias_scale_add(patches, wmat, bias, skip, scale_res, scale_skip):
    m, kc = patches.shape
    cout = wmat.shape[1]
    tile_m = _row_tile(m)
    scales = jnp.concatenate(
        [scale_res.reshape(-1), scale_skip.reshape(-1)]).astype(jnp.float32)
    return pl.pallas_call(
        _mm_bias_scale_add_kernel,
        out_shape=jax.ShapeDtypeStruct((m, cout), patches.dtype),
        grid_spec=pltpu.PrefetchScalarGridSpec(
            num_scalar_prefetch=0,
            grid=(pl.cdiv(m, tile_m),),
            in_specs=[
                pl.BlockSpec(memory_space=pltpu.SMEM),           # scales (2,) f32
                pl.BlockSpec((tile_m, kc), lambda i: (i, 0)),    # patches
                pl.BlockSpec((kc, cout), lambda i: (0, 0)),      # weight
                pl.BlockSpec((1, cout), lambda i: (0, 0)),       # bias
                pl.BlockSpec((tile_m, cout), lambda i: (i, 0)),  # skip (residual)
            ],
            out_specs=pl.BlockSpec((tile_m, cout), lambda i: (i, 0)),
        ),
        compiler_params=pltpu.CompilerParams(
            dimension_semantics=("parallel",)),
    )(scales, patches, wmat, bias.reshape(1, cout), skip)


# ----------------------------------------------------------------------------
# Conv plumbing (weight-norm reparam + im2col are plain-JAX layout work)
# ----------------------------------------------------------------------------

def _weight_norm(v, g):
    # torch.nn.utils.weight_norm with dim=0: w = g * v / ||v|| (norm over Cin,Kh,Kw)
    norm = jnp.sqrt(jnp.sum(v * v, axis=(1, 2, 3), keepdims=True))
    return v * (g.reshape(-1, 1, 1, 1) / norm)


def _wn_weight_matrix(v, g):
    # (Cout, Cin, K, K) -> (K*K*Cin, Cout); row ordering (kh, kw, ci)
    w = _weight_norm(v, g)
    cout, cin, k, _ = w.shape
    return jnp.transpose(w, (2, 3, 1, 0)).reshape(k * k * cin, cout)


def _im2col(x_nhwc, k):
    # (N, H, W, C) -> (N*H*W, K*K*C); column ordering (kh, kw, c)
    n, h, w, c = x_nhwc.shape
    p = k // 2
    xp = jnp.pad(x_nhwc, ((0, 0), (p, p), (p, p), (0, 0)))
    cols = [xp[:, kh:kh + h, kw:kw + w, :]
            for kh in range(k) for kw in range(k)]
    return jnp.concatenate(cols, axis=-1).reshape(n * h * w, k * k * c)


def _conv_wn_relu(x_nhwc, conv_p):
    n, h, w, _ = x_nhwc.shape
    k = conv_p["v"].shape[-1]
    patches = _im2col(x_nhwc, k)
    wmat = _wn_weight_matrix(conv_p["v"], conv_p["g"])
    out = _matmul_bias_relu(patches, wmat, conv_p["b"])
    return out.reshape(n, h, w, wmat.shape[1])


def _conv_wn_scale_add(x_nhwc, conv_p, skip_nhwc, scale_res, scale_skip):
    n, h, w, _ = x_nhwc.shape
    k = conv_p["v"].shape[-1]
    patches = _im2col(x_nhwc, k)
    wmat = _wn_weight_matrix(conv_p["v"], conv_p["g"])
    cout = wmat.shape[1]
    skip = skip_nhwc.reshape(n * h * w, cout)
    out = _matmul_bias_scale_add(patches, wmat, conv_p["b"], skip,
                                 scale_res, scale_skip)
    return out.reshape(n, h, w, cout)


# ----------------------------------------------------------------------------
# LFB forward (matches the PyTorch module, NCHW in / NCHW out)
# ----------------------------------------------------------------------------

def lfb_forward(params, x_nchw):
    x = jnp.transpose(x_nchw, (0, 2, 3, 1))        # NHWC internally
    s = x
    outs = []
    for awru in params["awru"]:
        body = _conv_wn_relu(x, awru["conv1"])                       # conv1 + ReLU
        x = _conv_wn_scale_add(body, awru["conv2"], x,               # conv2 fused w/
                               awru["res_scale"], awru["x_scale"])   # Scale + residual
        outs.append(x)
    cat = jnp.concatenate(outs, axis=-1)
    y = _conv_wn_scale_add(cat, params["reduction"], s,
                           params["res_scale"], params["x_scale"])
    return jnp.transpose(y, (0, 3, 1, 2))          # back to NCHW


def _init_conv(key, cin, cout, k):
    kv, kg, kb = jax.random.split(key, 3)
    bound = 1.0 / math.sqrt(cin * k * k)
    v = jax.random.uniform(kv, (cout, cin, k, k), jnp.float32, -bound, bound)
    g = jax.random.uniform(kg, (cout,), jnp.float32, 0.5, 1.5)
    b = jax.random.uniform(kb, (cout,), jnp.float32, -bound, bound)
    return {"v": v, "g": g, "b": b}


class LFBPallas:
    """JAX/Pallas port of the PyTorch LFB module (AWSRN)."""

    # TODO(synk): only the module's default activation (ReLU) is implemented.
    def __init__(self, n_feats, kernel_size, block_feats, n_awru,
                 res_scale=1.0, *, key):
        keys = jax.random.split(key, 2 * n_awru + 1)
        awru = []
        for i in range(n_awru):
            awru.append({
                "conv1": _init_conv(keys[2 * i], n_feats, block_feats, kernel_size),
                "conv2": _init_conv(keys[2 * i + 1], block_feats, n_feats, kernel_size),
                "res_scale": jnp.array([res_scale], jnp.float32),   # Scale(res_scale)
                "x_scale": jnp.array([1.0], jnp.float32),           # Scale(1)
            })
        self.params = {
            "awru": awru,
            "reduction": _init_conv(keys[-1], n_feats * n_awru, n_feats, kernel_size),
            "res_scale": jnp.array([res_scale], jnp.float32),
            "x_scale": jnp.array([1.0], jnp.float32),
        }
        self._fwd = jax.jit(lfb_forward)

    def __call__(self, x_nchw):
        return self._fwd(self.params, x_nchw)


# ----------------------------------------------------------------------------
# Pure-JAX reference (XLA convs) for correctness checking
# ----------------------------------------------------------------------------

def _ref_conv(x_nchw, conv_p):
    w = _weight_norm(conv_p["v"], conv_p["g"])
    k = w.shape[-1]
    p = k // 2
    y = lax.conv_general_dilated(
        x_nchw, w, window_strides=(1, 1), padding=((p, p), (p, p)),
        dimension_numbers=("NCHW", "OIHW", "NCHW"),
        precision=lax.Precision.HIGHEST)
    return y + conv_p["b"][None, :, None, None]


def ref_lfb(params, x_nchw):
    s = x_nchw
    x = x_nchw
    outs = []
    for awru in params["awru"]:
        body = _ref_conv(x, awru["conv1"])
        body = jnp.maximum(body, 0.0)
        body = _ref_conv(body, awru["conv2"])
        x = awru["res_scale"][0] * body + awru["x_scale"][0] * x
        outs.append(x)
    res = _ref_conv(jnp.concatenate(outs, axis=1), params["reduction"])
    return params["res_scale"][0] * res + params["x_scale"][0] * s


if __name__ == "__main__":
    key = jax.random.PRNGKey(0)
    k_params, k_x = jax.random.split(key)

    n_feats, kernel_size, block_feats, n_awru, res_scale = 4, 3, 8, 2, 0.5
    module = LFBPallas(n_feats, kernel_size, block_feats, n_awru,
                       res_scale=res_scale, key=k_params)

    x = jax.random.normal(k_x, (2, n_feats, 16, 16), dtype=jnp.float32)

    out = jax.block_until_ready(module(x))
    ref = jax.block_until_ready(ref_lfb(module.params, x))

    assert out.shape == x.shape and out.dtype == x.dtype
    err = float(jnp.max(jnp.abs(out - ref)))
    assert err < 2e-3, f"max abs error {err}"

    print("KERNEL_OK")
</pallas_src>

<mosaic_0001>
module attributes {stable_mosaic.version = 11 : i64} {
  func.func @_mm_bias_relu_kernel(%arg0: i32, %arg1: memref<512x36xf32, #tpu.memory_space<vmem>>, %arg2: memref<36x8xf32, #tpu.memory_space<vmem>>, %arg3: memref<1x8xf32, #tpu.memory_space<vmem>>, %arg4: memref<512x8xf32, #tpu.memory_space<vmem>>) attributes {dimension_semantics = [#tpu.dimension_semantics<parallel>], iteration_bounds = array<i64: 1>, scalar_prefetch = 0 : i64, scratch_operands = 0 : i64, tpu.core_type = #tpu.core_type<tc>, window_params = [{transform_indices = @transform_0, window_bounds = array<i64: 512, 36>}, {pipeline_mode = #tpu.pipeline_mode<synchronous>, transform_indices = @transform_1, window_bounds = array<i64: 36, 8>}, {pipeline_mode = #tpu.pipeline_mode<synchronous>, transform_indices = @transform_2, window_bounds = array<i64: 1, 8>}, {transform_indices = @transform_3, window_bounds = array<i64: 512, 8>}]} {
    %c0 = arith.constant 0 : index
    %c0_0 = arith.constant 0 : index
    %0 = vector.load %arg1[%c0, %c0_0] : memref<512x36xf32, #tpu.memory_space<vmem>>, vector<512x36xf32>
    %c0_1 = arith.constant 0 : index
    %c0_2 = arith.constant 0 : index
    %1 = vector.load %arg2[%c0_1, %c0_2] : memref<36x8xf32, #tpu.memory_space<vmem>>, vector<36x8xf32>
    %cst = arith.constant dense<0.000000e+00> : vector<512x8xf32>
    %2 = tpu.matmul %0, %1, %cst {dimension_numbers = #tpu.dot_dimension_numbers<[1], [0], [0], [1], [0, 0, 1, 1], [], []>} : vector<512x36xf32>, vector<36x8xf32>, vector<512x8xf32> -> vector<512x8xf32>
    %c0_3 = arith.constant 0 : index
    %c0_4 = arith.constant 0 : index
    %3 = vector.load %arg3[%c0_3, %c0_4] : memref<1x8xf32, #tpu.memory_space<vmem>>, vector<1x8xf32>
    %4 = vector.broadcast %3 : vector<1x8xf32> to vector<512x8xf32>
    %5 = arith.addf %2, %4 : vector<512x8xf32>
    %cst_5 = arith.constant 0.000000e+00 : f32
    %6 = vector.broadcast %cst_5 : f32 to vector<512x8xf32>
    %7 = arith.maximumf %5, %6 : vector<512x8xf32>
    %c0_6 = arith.constant 0 : index
    %c0_7 = arith.constant 0 : index
    %8 = vector.load %arg4[%c0_6, %c0_7] : memref<512x8xf32, #tpu.memory_space<vmem>>, vector<512x8xf32>
    tpu.vector_store %arg4[%c0_6, %c0_7], %7 {strides = array<i32>} : memref<512x8xf32, #tpu.memory_space<vmem>>, vector<512x8xf32>,
    return
  }
  func.func @transform_0(%arg0: i32) -> (i32, i32) {
    %c0_i32 = arith.constant 0 : i32
    %c0_i32_0 = arith.constant 0 : i32
    return %arg0, %c0_i32 : i32, i32
  }
  func.func @transform_1(%arg0: i32) -> (i32, i32) {
    %c0_i32 = arith.constant 0 : i32
    %c0_i32_0 = arith.constant 0 : i32
    %c0_i32_1 = arith.constant 0 : i32
    return %c0_i32, %c0_i32_0 : i32, i32
  }
  func.func @transform_2(%arg0: i32) -> (i32, i32) {
    %c0_i32 = arith.constant 0 : i32
    %c0_i32_0 = arith.constant 0 : i32
    %c0_i32_1 = arith.constant 0 : i32
    return %c0_i32, %c0_i32_0 : i32, i32
  }
  func.func @transform_3(%arg0: i32) -> (i32, i32) {
    %c0_i32 = arith.constant 0 : i32
    %c0_i32_0 = arith.constant 0 : i32
    return %arg0, %c0_i32 : i32, i32
  }
}

module attributes {stable_mosaic.version = 11 : i64} {
  func.func @_mm_bias_scale_add_kernel(%arg0: i32, %arg1: memref<2xf32, #tpu.memory_space<smem>>, %arg2: memref<512x72xf32, #tpu.memory_space<vmem>>, %arg3: memref<72x4xf32, #tpu.memory_space<vmem>>, %arg4: memref<1x4xf32, #tpu.memory_space<vmem>>, %arg5: memref<512x4xf32, #tpu.memory_space<vmem>>, %arg6: memref<512x4xf32, #tpu.memory_space<vmem>>) attributes {dimension_semantics = [#tpu.dimension_semantics<parallel>], iteration_bounds = array<i64: 1>, scalar_prefetch = 0 : i64, scratch_operands = 0 : i64, tpu.core_type = #tpu.core_type<tc>, window_params = [{transform_indices = @transform_0, window_bounds = array<i64: 2>}, {transform_indices = @transform_1, window_bounds = array<i64: 512, 72>}, {pipeline_mode = #tpu.pipeline_mode<synchronous>, transform_indices = @transform_2, window_bounds = array<i64: 72, 4>}, {pipeline_mode = #tpu.pipeline_mode<synchronous>, transform_indices = @transform_3, window_bounds = array<i64: 1, 4>}, {transform_indices = @transform_4, window_bounds = array<i64: 512, 4>}, {transform_indices = @transform_5, window_bounds = array<i64: 512, 4>}]} {
    %c0 = arith.constant 0 : index
    %c0_0 = arith.constant 0 : index
    %0 = vector.load %arg2[%c0, %c0_0] : memref<512x72xf32, #tpu.memory_space<vmem>>, vector<512x72xf32>
    %c0_1 = arith.constant 0 : index
    %c0_2 = arith.constant 0 : index
    %1 = vector.load %arg3[%c0_1, %c0_2] : memref<72x4xf32, #tpu.memory_space<vmem>>, vector<72x4xf32>
    %cst = arith.constant dense<0.000000e+00> : vector<512x4xf32>
    %2 = tpu.matmul %0, %1, %cst {dimension_numbers = #tpu.dot_dimension_numbers<[1], [0], [0], [1], [0, 0, 1, 1], [], []>} : vector<512x72xf32>, vector<72x4xf32>, vector<512x4xf32> -> vector<512x4xf32>
    %c0_3 = arith.constant 0 : index
    %c0_4 = arith.constant 0 : index
    %3 = vector.load %arg4[%c0_3, %c0_4] : memref<1x4xf32, #tpu.memory_space<vmem>>, vector<1x4xf32>
    %4 = vector.broadcast %3 : vector<1x4xf32> to vector<512x4xf32>
    %5 = arith.addf %2, %4 : vector<512x4xf32>
    %c0_5 = arith.constant 0 : index
    %6 = memref.load %arg1[%c0_5] : memref<2xf32, #tpu.memory_space<smem>>
    %7 = vector.broadcast %6 : f32 to vector<512x4xf32>
    %8 = arith.mulf %7, %5 : vector<512x4xf32>
    %c1 = arith.constant 1 : index
    %9 = memref.load %arg1[%c1] : memref<2xf32, #tpu.memory_space<smem>>
    %c0_6 = arith.constant 0 : index
    %c0_7 = arith.constant 0 : index
    %10 = vector.load %arg5[%c0_6, %c0_7] : memref<512x4xf32, #tpu.memory_space<vmem>>, vector<512x4xf32>
    %11 = vector.broadcast %9 : f32 to vector<512x4xf32>
    %12 = arith.mulf %11, %10 : vector<512x4xf32>
    %13 = arith.addf %8, %12 : vector<512x4xf32>
    %c0_8 = arith.constant 0 : index
    %c0_9 = arith.constant 0 : index
    %14 = vector.load %arg6[%c0_8, %c0_9] : memref<512x4xf32, #tpu.memory_space<vmem>>, vector<512x4xf32>
    tpu.vector_store %arg6[%c0_8, %c0_9], %13 {strides = array<i32>} : memref<512x4xf32, #tpu.memory_space<vmem>>, vector<512x4xf32>,
    return
  }
  func.func @transform_0(%arg0: i32) -> i32 {
    %c0_i32 = arith.constant 0 : i32
    %c0_i32_0 = arith.constant 0 : i32
    return %c0_i32 : i32
  }
  func.func @transform_1(%arg0: i32) -> (i32, i32) {
    %c0_i32 = arith.constant 0 : i32
    %c0_i32_0 = arith.constant 0 : i32
    return %arg0, %c0_i32 : i32, i32
  }
  func.func @transform_2(%arg0: i32) -> (i32, i32) {
    %c0_i32 = arith.constant 0 : i32
    %c0_i32_0 = arith.constant 0 : i32
    %c0_i32_1 = arith.constant 0 : i32
    return %c0_i32, %c0_i32_0 : i32, i32
  }
  func.func @transform_3(%arg0: i32) -> (i32, i32) {
    %c0_i32 = arith.constant 0 : i32
    %c0_i32_0 = arith.constant 0 : i32
    %c0_i32_1 = arith.constant 0 : i32
    return %c0_i32, %c0_i32_0 : i32, i32
  }
  func.func @transform_4(%arg0: i32) -> (i32, i32) {
    %c0_i32 = arith.constant 0 : i32
    %c0_i32_0 = arith.constant 0 : i32
    return %arg0, %c0_i32 : i32, i32
  }
  func.func @transform_5(%arg0: i32) -> (i32, i32) {
    %c0_i32 = arith.constant 0 : i32
    %c0_i32_0 = arith.constant 0 : i32
    return %arg0, %c0_i32 : i32, i32
  }
}

</mosaic_0001>

<bundles_post_ra>
// kernel: lfb_forward.5
= control target key start
LH: loop header
LB: loop body
LE: loop exit
PB: predicated region body
PF: predicated region fallthrough
CT: control target
= control target key end

     0   :  { %vm90_vm0 = vcmask 293888   ;;  %vm283_vm1 = vcmask 1043456   ;;  %vm736_vm2 = vcmask 64512   ;;  %s1676_s1 = inlined_call_operand.vmem [shape: f32[36,8], index: 1, kind: input, shape index: {}]   ;;  %s1677_s0 = inlined_call_operand.vmem [shape: f32[512,36], index: 0, kind: input, shape index: {}]   ;;  %s1678_s2 = inlined_call_operand.vmem [shape: f32[1,8], index: 2, kind: input, shape index: {}]   ;;  %s1679_s3 = inlined_call_operand.vmem [shape: f32[512,8], index: 3, kind: output, shape index: {}]  }
   0x1   :  { %v78_v0 = vld [vmem:[%s1676_s1] sm:$0xff]  ;;  %v79_v1 = vld [vmem:[%s1676_s1 + $0x8] sm:$0xff]  ;;  %v80_v2 = vld [vmem:[%s1676_s1 + $0x10] sm:$0xff] }
   0x2   :  { %v1046_v3 = vpack.c.bf16 %v79_v1, %v78_v0  ;;  %v81_v4 = vld [vmem:[%s1676_s1 + $0x18] sm:$0xff]  ;;  %v14_v5 = vld [vmem:[%s1677_s0] sm:$0xff]  ;;  %v15_v9 = vld [vmem:[%s1677_s0 + $0x8] sm:$0xff] }
   0x3   :  { %v1050_v6 = vpack.c.bf16 %v81_v4, %v80_v2  ;;  %950 = vmatprep.mubr.msk.f32.mxu0 %vm90_vm0, %v14_v5  ;;  %v46_v7 = vld [vmem:[%s1677_s0 + $0x100] sm:$0xff]  ;;  %v47_v10 = vld [vmem:[%s1677_s0 + $0x108] sm:$0xff]  ;;  %v16_v11 = vld [vmem:[%s1677_s0 + $0x10] sm:$0xff] }
   0x4   :  { %1047 = vmatprep.subr.bf16.mxu0 %v1046_v3  ;;  %1054 = vmatprep.subr.bf16.mxu1 %v1046_v3  ;;  %v82_v8 = vld [vmem:[%s1676_s1 + $0x20] sm:$0xf]  ;;  %v48_v12 = vld [vmem:[%s1677_s0 + $0x110] sm:$0xff]  ;;  %v17_v13 = vld [vmem:[%s1677_s0 + $0x18] sm:$0xff] }
   0x5   :  { %1049 = vmatpush3.bf16.msra.mxu0 %v1046_v3  ;;  %1057 = vmatpush3.bf16.msra.mxu1 %v1046_v3  ;;  %v49_v14 = vld [vmem:[%s1677_s0 + $0x118] sm:$0xff]  ;;  %v18_v15 = vld [vmem:[%s1677_s0 + $0x20] sm:$0xff]  ;;  %v19_v17 = vld [vmem:[%s1677_s0 + $0x28] sm:$0xff] }
   0x6   :  { %1051 = vmatprep.subr.bf16.mxu0 %v1050_v6  ;;  %1055 = vmatprep.subr.bf16.mxu1 %v1050_v6  ;;  %v50_v16 = vld [vmem:[%s1677_s0 + $0x120] sm:$0xff]  ;;  %v51_v18 = vld [vmem:[%s1677_s0 + $0x128] sm:$0xff]  ;;  %v20_v19 = vld [vmem:[%s1677_s0 + $0x30] sm:$0xff] }
   0x7   :  { %998 = vmatprep.mubr.msk.f32.mxu1 %vm90_vm0, %v46_v7  ;;  %v52_v20 = vld [vmem:[%s1677_s0 + $0x130] sm:$0xff]  ;;  %v21_v21 = vld [vmem:[%s1677_s0 + $0x38] sm:$0xff]  ;;  %v22_v23 = vld [vmem:[%s1677_s0 + $0x40] sm:$0xff] }
   0x8   :  { %v53_v22 = vld [vmem:[%s1677_s0 + $0x138] sm:$0xff]  ;;  %v54_v24 = vld [vmem:[%s1677_s0 + $0x140] sm:$0xff]  ;;  %v23_v25 = vld [vmem:[%s1677_s0 + $0x48] sm:$0xff] }
   0x9   :  { %1053 = vmatpush3.bf16.msra.mxu0 %v1050_v6  ;;  %1058 = vmatpush3.bf16.msra.mxu1 %v1050_v6  ;;  %v55_v26 = vld [vmem:[%s1677_s0 + $0x148] sm:$0xff]  ;;  %v24_v27 = vld [vmem:[%s1677_s0 + $0x50] sm:$0xff]  ;;  %v25_v29 = vld [vmem:[%s1677_s0 + $0x58] sm:$0xff] }
   0xa   :  { %948 = vmatprep.subr.msk.mxu0 %vm283_vm1, %v82_v8  ;;  %1056 = vmatprep.subr.msk.mxu1 %vm283_vm1, %v82_v8  ;;  %v56_v28 = vld [vmem:[%s1677_s0 + $0x150] sm:$0xff]  ;;  %v57_v30 = vld [vmem:[%s1677_s0 + $0x158] sm:$0xff]  ;;  %v26_v31 = vld [vmem:[%s1677_s0 + $0x60] sm:$0xff] }
   0xb   :  { %v58_v32 = vld [vmem:[%s1677_s0 + $0x160] sm:$0xff]  ;;  %v27_v33 = vld [vmem:[%s1677_s0 + $0x68] sm:$0xff]  ;;  %v28_v35 = vld [vmem:[%s1677_s0 + $0x70] sm:$0xff] }
   0xc   :  { %v59_v34 = vld [vmem:[%s1677_s0 + $0x168] sm:$0xff]  ;;  %v60_v36 = vld [vmem:[%s1677_s0 + $0x170] sm:$0xff]  ;;  %v29_v37 = vld [vmem:[%s1677_s0 + $0x78] sm:$0xff] }
   0xd   :  { %949 = vmatpush3.msk.msra.mxu0 %vm283_vm1, %v82_v8  ;;  %1059 = vmatpush3.msk.msra.mxu1 %vm283_vm1, %v82_v8  ;;  %v61_v38 = vld [vmem:[%s1677_s0 + $0x178] sm:$0xff]  ;;  %v30_v39 = vld [vmem:[%s1677_s0 + $0x80] sm:$0xff]  ;;  %v31_v41 = vld [vmem:[%s1677_s0 + $0x88] sm:$0xff] }
   0xe   :  { %951 = vmatmul.mubr.msk.f32.vlgmr.msra.gmra.mrb[0].mxu0 %vm90_vm0, %v15_v9  ;;  %999 = vmatmul.mubr.msk.f32.vlgmr.msra.gmra.mrb[0].mxu1 %vm90_vm0, %v47_v10  ;;  %v62_v40 = vld [vmem:[%s1677_s0 + $0x180] sm:$0xff]  ;;  %v63_v42 = vld [vmem:[%s1677_s0 + $0x188] sm:$0xff]  ;;  %v32_v43 = vld [vmem:[%s1677_s0 + $0x90] sm:$0xff] }
   0xf   :  { %953 = vmatprep.mubr.msk.f32.mxu0 %vm90_vm0, %v16_v11  ;;  %1001 = vmatprep.mubr.msk.f32.mxu1 %vm90_vm0, %v48_v12  ;;  %v64_v44 = vld [vmem:[%s1677_s0 + $0x190] sm:$0xff]  ;;  %v33_v45 = vld [vmem:[%s1677_s0 + $0x98] sm:$0xff]  ;;  %v34_v47 = vld [vmem:[%s1677_s0 + $0xa0] sm:$0xff] }
  0x10   :  { %v65_v46 = vld [vmem:[%s1677_s0 + $0x198] sm:$0xff]  ;;  %v66_v48 = vld [vmem:[%s1677_s0 + $0x1a0] sm:$0xff]  ;;  %v35_v49 = vld [vmem:[%s1677_s0 + $0xa8] sm:$0xff] }
  0x11   :  { %v67_v50 = vld [vmem:[%s1677_s0 + $0x1a8] sm:$0xff]  ;;  %v36_v51 = vld [vmem:[%s1677_s0 + $0xb0] sm:$0xff]  ;;  %v37_v53 = vld [vmem:[%s1677_s0 + $0xb8] sm:$0xff] }
  0x12   :  { %954 = vmatmul.mubr.msk.f32.gmra.mrb[2].mxu0 %vm90_vm0, %v17_v13  ;;  %1002 = vmatmul.mubr.msk.f32.gmra.mrb[2].mxu1 %vm90_vm0, %v49_v14  ;;  %v68_v52 = vld [vmem:[%s1677_s0 + $0x1b0] sm:$0xff]  ;;  %v69_v54 = vld [vmem:[%s1677_s0 + $0x1b8] sm:$0xff]  ;;  %v38_v55 = vld [vmem:[%s1677_s0 + $0xc0] sm:$0xff] }
  0x13   :  { %956 = vmatprep.mubr.msk.f32.mxu0 %vm90_vm0, %v18_v15  ;;  %1004 = vmatprep.mubr.msk.f32.mxu1 %vm90_vm0, %v50_v16  ;;  %v70_v56 = vld [vmem:[%s1677_s0 + $0x1c0] sm:$0xff]  ;;  %v39_v57 = vld [vmem:[%s1677_s0 + $0xc8] sm:$0xff]  ;;  %v40_v59 = vld [vmem:[%s1677_s0 + $0xd0] sm:$0xff] }
  0x14   :  { %v71_v58 = vld [vmem:[%s1677_s0 + $0x1c8] sm:$0xff]  ;;  %v72_v60 = vld [vmem:[%s1677_s0 + $0x1d0] sm:$0xff]  ;;  %v41_v61 = vld [vmem:[%s1677_s0 + $0xd8] sm:$0xff] }
  0x15   :  { %v73_v62 = vld [vmem:[%s1677_s0 + $0x1d8] sm:$0xff]  ;;  %v42_v63 = vld [vmem:[%s1677_s0 + $0xe0] sm:$0xff]  ;;  %v43_v1 = vld [vmem:[%s1677_s0 + $0xe8] sm:$0xff] }
  0x16   :  { %957 = vmatmul.mubr.msk.f32.gmra.mrb[4].mxu0 %vm90_vm0, %v19_v17  ;;  %1005 = vmatmul.mubr.msk.f32.gmra.mrb[4].mxu1 %vm90_vm0, %v51_v18  ;;  %v74_v0 = vld [vmem:[%s1677_s0 + $0x1e0] sm:$0xff]  ;;  %v75_v2 = vld [vmem:[%s1677_s0 + $0x1e8] sm:$0xff]  ;;  %v44_v3 = vld [vmem:[%s1677_s0 + $0xf0] sm:$0xff] }
  0x17   :  { %959 = vmatprep.mubr.msk.f32.mxu0 %vm90_vm0, %v20_v19  ;;  %1007 = vmatprep.mubr.msk.f32.mxu1 %vm90_vm0, %v52_v20  ;;  %v76_v4 = vld [vmem:[%s1677_s0 + $0x1f0] sm:$0xff]  ;;  %v45_v5 = vld [vmem:[%s1677_s0 + $0xf8] sm:$0xff]  ;;  %v1354_v7 = vld [vmem:[%s1678_s2] ss:$0 sm:$0xff] }
  0x18   :  { %v77_v6 = vld [vmem:[%s1677_s0 + $0x1f8] sm:$0xff] }
  0x1a   :  { %960 = vmatmul.mubr.msk.f32.gmra.mrb[6].mxu0 %vm90_vm0, %v21_v21  ;;  %1008 = vmatmul.mubr.msk.f32.gmra.mrb[6].mxu1 %vm90_vm0, %v53_v22 }
  0x1b   :  { %962 = vmatprep.mubr.msk.f32.mxu0 %vm90_vm0, %v22_v23  ;;  %1010 = vmatprep.mubr.msk.f32.mxu1 %vm90_vm0, %v54_v24 }
  0x1e   :  { %963 = vmatmul.mubr.msk.f32.gmra.mrb[8].mxu0 %vm90_vm0, %v23_v25  ;;  %1011 = vmatmul.mubr.msk.f32.gmra.mrb[8].mxu1 %vm90_vm0, %v55_v26 }
  0x1f   :  { %965 = vmatprep.mubr.msk.f32.mxu0 %vm90_vm0, %v24_v27  ;;  %1013 = vmatprep.mubr.msk.f32.mxu1 %vm90_vm0, %v56_v28 }
  0x22   :  { %966 = vmatmul.mubr.msk.f32.gmra.mrb[10].mxu0 %vm90_vm0, %v25_v29  ;;  %1014 = vmatmul.mubr.msk.f32.gmra.mrb[10].mxu1 %vm90_vm0, %v57_v30 }
  0x23   :  { %968 = vmatprep.mubr.msk.f32.mxu0 %vm90_vm0, %v26_v31  ;;  %1016 = vmatprep.mubr.msk.f32.mxu1 %vm90_vm0, %v58_v32 }
  0x26   :  { %969 = vmatmul.mubr.msk.f32.gmra.mrb[12].mxu0 %vm90_vm0, %v27_v33  ;;  %1017 = vmatmul.mubr.msk.f32.gmra.mrb[12].mxu1 %vm90_vm0, %v59_v34 }
  0x27   :  { %971 = vmatprep.mubr.msk.f32.mxu0 %vm90_vm0, %v28_v35  ;;  %1019 = vmatprep.mubr.msk.f32.mxu1 %vm90_vm0, %v60_v36 }
  0x2a   :  { %972 = vmatmul.mubr.msk.f32.gmra.mrb[14].mxu0 %vm90_vm0, %v29_v37  ;;  %1020 = vmatmul.mubr.msk.f32.gmra.mrb[14].mxu1 %vm90_vm0, %v61_v38 }
  0x2b   :  { %974 = vmatprep.mubr.msk.f32.mxu0 %vm90_vm0, %v30_v39  ;;  %1022 = vmatprep.mubr.msk.f32.mxu1 %vm90_vm0, %v62_v40 }
  0x2e   :  { %975 = vmatmul.mubr.msk.f32.gmra.mrb[16].mxu0 %vm90_vm0, %v31_v41  ;;  %1023 = vmatmul.mubr.msk.f32.gmra.mrb[16].mxu1 %vm90_vm0, %v63_v42 }
  0x2f   :  { %977 = vmatprep.mubr.msk.f32.mxu0 %vm90_vm0, %v32_v43  ;;  %1025 = vmatprep.mubr.msk.f32.mxu1 %vm90_vm0, %v64_v44 }
  0x32   :  { %978 = vmatmul.mubr.msk.f32.gmra.mrb[18].mxu0 %vm90_vm0, %v33_v45  ;;  %1026 = vmatmul.mubr.msk.f32.gmra.mrb[18].mxu1 %vm90_vm0, %v65_v46 }
  0x33   :  { %980 = vmatprep.mubr.msk.f32.mxu0 %vm90_vm0, %v34_v47  ;;  %1028 = vmatprep.mubr.msk.f32.mxu1 %vm90_vm0, %v66_v48 }
  0x36   :  { %981 = vmatmul.mubr.msk.f32.gmra.mrb[20].mxu0 %vm90_vm0, %v35_v49  ;;  %1029 = vmatmul.mubr.msk.f32.gmra.mrb[20].mxu1 %vm90_vm0, %v67_v50 }
  0x37   :  { %983 = vmatprep.mubr.msk.f32.mxu0 %vm90_vm0, %v36_v51  ;;  %1031 = vmatprep.mubr.msk.f32.mxu1 %vm90_vm0, %v68_v52 }
  0x3a   :  { %984 = vmatmul.mubr.msk.f32.gmra.mrb[22].mxu0 %vm90_vm0, %v37_v53  ;;  %1032 = vmatmul.mubr.msk.f32.gmra.mrb[22].mxu1 %vm90_vm0, %v69_v54 }
  0x3b   :  { %986 = vmatprep.mubr.msk.f32.mxu0 %vm90_vm0, %v38_v55  ;;  %1034 = vmatprep.mubr.msk.f32.mxu1 %vm90_vm0, %v70_v56 }
  0x3e   :  { %987 = vmatmul.mubr.msk.f32.gmra.mrb[24].mxu0 %vm90_vm0, %v39_v57  ;;  %1035 = vmatmul.mubr.msk.f32.gmra.mrb[24].mxu1 %vm90_vm0, %v71_v58 }
  0x3f   :  { %989 = vmatprep.mubr.msk.f32.mxu0 %vm90_vm0, %v40_v59  ;;  %1037 = vmatprep.mubr.msk.f32.mxu1 %vm90_vm0, %v72_v60 }
  0x42   :  { %990 = vmatmul.mubr.msk.f32.gmra.mrb[26].mxu0 %vm90_vm0, %v41_v61  ;;  %1038 = vmatmul.mubr.msk.f32.gmra.mrb[26].mxu1 %vm90_vm0, %v73_v62 }
  0x43   :  { %992 = vmatprep.mubr.msk.f32.mxu0 %vm90_vm0, %v42_v63  ;;  %1040 = vmatprep.mubr.msk.f32.mxu1 %vm90_vm0, %v74_v0 }
  0x46   :  { %993 = vmatmul.mubr.msk.f32.gmra.mrb[28].mxu0 %vm90_vm0, %v43_v1  ;;  %1041 = vmatmul.mubr.msk.f32.gmra.mrb[28].mxu1 %vm90_vm0, %v75_v2 }
  0x47   :  { %995 = vmatprep.mubr.msk.f32.mxu0 %vm90_vm0, %v44_v3  ;;  %1043 = vmatprep.mubr.msk.f32.mxu1 %vm90_vm0, %v76_v4 }
  0x4a   :  { %996 = vmatmul.mubr.msk.f32.gmra.mrb[30].mxu0 %vm90_vm0, %v45_v5  ;;  %1044 = vmatmul.mubr.msk.f32.gmra.mrb[30].mxu1 %vm90_vm0, %v77_v6 }
  0xe1   :  { %v952_v8 = vpop.f32.mrb[0].mxu0  ;;  %v1000_v9 = vpop.f32.mrb[0].mxu1 }
  0xe2   :  { %v359_v10 = vadd.f32 %v952_v8, %v1354_v7  ;;  %v519_v11 = vadd.f32 %v1000_v9, %v1354_v7  ;;  %v353_v12 = vpop.f32.mrb[1].mxu0  ;;  %v513_v13 = vpop.f32.mrb[1].mxu1 }
  0xe3   :  { %v354_v14 = vadd.f32 %v1354_v7, %v353_v12  ;;  %v514_v15 = vadd.f32 %v1354_v7, %v513_v13 }
  0xe4   :  { %v673_v16 = vmax.f32 %v359_v10, 0.0  ;;  %v705_v17 = vmax.f32 %v519_v11, 0.0 }
  0xe5   :  { %v672_v18 = vmax.f32 %v354_v14, 0.0  ;;  %v704_v19 = vmax.f32 %v514_v15, 0.0  ;;  %v955_v20 = vpop.f32.mrb[2].mxu0  ;;  %v1003_v21 = vpop.f32.mrb[2].mxu1 }
  0xe6   :  { %738 = vst.msk [vmem:[%s1679_s3 + $0x8] sm:$0xff] %vm736_vm2, %v673_v16  ;;  %770 = vst.msk [vmem:[%s1679_s3 + $0x108] sm:$0xff] %vm736_vm2, %v705_v17  ;;  %v369_v22 = vadd.f32 %v955_v20, %v1354_v7  ;;  %v529_v23 = vadd.f32 %v1003_v21, %v1354_v7  ;;  %v363_v24 = vpop.f32.mrb[3].mxu0  ;;  %v523_v25 = vpop.f32.mrb[3].mxu1 }
  0xe7   :  { %737 = vst.msk [vmem:[%s1679_s3] sm:$0xff] %vm736_vm2, %v672_v18  ;;  %769 = vst.msk [vmem:[%s1679_s3 + $0x100] sm:$0xff] %vm736_vm2, %v704_v19  ;;  %v364_v26 = vadd.f32 %v1354_v7, %v363_v24  ;;  %v524_v27 = vadd.f32 %v1354_v7, %v523_v25 }
  0xe8   :  { %v675_v28 = vmax.f32 %v369_v22, 0.0  ;;  %v707_v29 = vmax.f32 %v529_v23, 0.0 }
  0xe9   :  { %v674_v30 = vmax.f32 %v364_v26, 0.0  ;;  %v706_v31 = vmax.f32 %v524_v27, 0.0  ;;  %v958_v32 = vpop.f32.mrb[4].mxu0  ;;  %v1006_v33 = vpop.f32.mrb[4].mxu1 }
  0xea   :  { %740 = vst.msk [vmem:[%s1679_s3 + $0x18] sm:$0xff] %vm736_vm2, %v675_v28  ;;  %772 = vst.msk [vmem:[%s1679_s3 + $0x118] sm:$0xff] %vm736_vm2, %v707_v29  ;;  %v379_v34 = vadd.f32 %v958_v32, %v1354_v7  ;;  %v539_v35 = vadd.f32 %v1006_v33, %v1354_v7  ;;  %v373_v36 = vpop.f32.mrb[5].mxu0  ;;  %v533_v37 = vpop.f32.mrb[5].mxu1 }
  0xeb   :  { %739 = vst.msk [vmem:[%s1679_s3 + $0x10] sm:$0xff] %vm736_vm2, %v674_v30  ;;  %771 = vst.msk [vmem:[%s1679_s3 + $0x110] sm:$0xff] %vm736_vm2, %v706_v31  ;;  %v374_v38 = vadd.f32 %v1354_v7, %v373_v36  ;;  %v534_v39 = vadd.f32 %v1354_v7, %v533_v37 }
  0xec   :  { %v677_v40 = vmax.f32 %v379_v34, 0.0  ;;  %v709_v41 = vmax.f32 %v539_v35, 0.0 }
  0xed   :  { %v676_v42 = vmax.f32 %v374_v38, 0.0  ;;  %v708_v43 = vmax.f32 %v534_v39, 0.0  ;;  %v961_v44 = vpop.f32.mrb[6].mxu0  ;;  %v1009_v45 = vpop.f32.mrb[6].mxu1 }
  0xee   :  { %742 = vst.msk [vmem:[%s1679_s3 + $0x28] sm:$0xff] %vm736_vm2, %v677_v40  ;;  %774 = vst.msk [vmem:[%s1679_s3 + $0x128] sm:$0xff] %vm736_vm2, %v709_v41  ;;  %v389_v46 = vadd.f32 %v961_v44, %v1354_v7  ;;  %v549_v47 = vadd.f32 %v1009_v45, %v1354_v7  ;;  %v383_v48 = vpop.f32.mrb[7].mxu0  ;;  %v543_v49 = vpop.f32.mrb[7].mxu1 }
  0xef   :  { %741 = vst.msk [vmem:[%s1679_s3 + $0x20] sm:$0xff] %vm736_vm2, %v676_v42  ;;  %773 = vst.msk [vmem:[%s1679_s3 + $0x120] sm:$0xff] %vm736_vm2, %v708_v43  ;;  %v384_v50 = vadd.f32 %v1354_v7, %v383_v48  ;;  %v544_v51 = vadd.f32 %v1354_v7, %v543_v49 }
  0xf0   :  { %v679_v52 = vmax.f32 %v389_v46, 0.0  ;;  %v711_v53 = vmax.f32 %v549_v47, 0.0 }
  0xf1   :  { %v678_v54 = vmax.f32 %v384_v50, 0.0  ;;  %v710_v55 = vmax.f32 %v544_v51, 0.0  ;;  %v964_v56 = vpop.f32.mrb[8].mxu0  ;;  %v1012_v57 = vpop.f32.mrb[8].mxu1 }
  0xf2   :  { %744 = vst.msk [vmem:[%s1679_s3 + $0x38] sm:$0xff] %vm736_vm2, %v679_v52  ;;  %776 = vst.msk [vmem:[%s1679_s3 + $0x138] sm:$0xff] %vm736_vm2, %v711_v53  ;;  %v399_v58 = vadd.f32 %v964_v56, %v1354_v7  ;;  %v559_v59 = vadd.f32 %v1012_v57, %v1354_v7  ;;  %v393_v60 = vpop.f32.mrb[9].mxu0  ;;  %v553_v61 = vpop.f32.mrb[9].mxu1 }
  0xf3   :  { %743 = vst.msk [vmem:[%s1679_s3 + $0x30] sm:$0xff] %vm736_vm2, %v678_v54  ;;  %775 = vst.msk [vmem:[%s1679_s3 + $0x130] sm:$0xff] %vm736_vm2, %v710_v55  ;;  %v394_v62 = vadd.f32 %v1354_v7, %v393_v60  ;;  %v554_v63 = vadd.f32 %v1354_v7, %v553_v61 }
  0xf4   :  { %v681_v0 = vmax.f32 %v399_v58, 0.0  ;;  %v713_v1 = vmax.f32 %v559_v59, 0.0 }
  0xf5   :  { %v680_v2 = vmax.f32 %v394_v62, 0.0  ;;  %v712_v3 = vmax.f32 %v554_v63, 0.0  ;;  %v967_v4 = vpop.f32.mrb[10].mxu0  ;;  %v1015_v5 = vpop.f32.mrb[10].mxu1 }
  0xf6   :  { %746 = vst.msk [vmem:[%s1679_s3 + $0x48] sm:$0xff] %vm736_vm2, %v681_v0  ;;  %778 = vst.msk [vmem:[%s1679_s3 + $0x148] sm:$0xff] %vm736_vm2, %v713_v1  ;;  %v409_v6 = vadd.f32 %v967_v4, %v1354_v7  ;;  %v569_v8 = vadd.f32 %v1015_v5, %v1354_v7  ;;  %v403_v9 = vpop.f32.mrb[11].mxu0  ;;  %v563_v10 = vpop.f32.mrb[11].mxu1 }
  0xf7   :  { %745 = vst.msk [vmem:[%s1679_s3 + $0x40] sm:$0xff] %vm736_vm2, %v680_v2  ;;  %777 = vst.msk [vmem:[%s1679_s3 + $0x140] sm:$0xff] %vm736_vm2, %v712_v3  ;;  %v404_v11 = vadd.f32 %v1354_v7, %v403_v9  ;;  %v564_v12 = vadd.f32 %v1354_v7, %v563_v10 }
  0xf8   :  { %v683_v13 = vmax.f32 %v409_v6, 0.0  ;;  %v715_v14 = vmax.f32 %v569_v8, 0.0 }
  0xf9   :  { %v682_v15 = vmax.f32 %v404_v11, 0.0  ;;  %v714_v16 = vmax.f32 %v564_v12, 0.0  ;;  %v970_v17 = vpop.f32.mrb[12].mxu0  ;;  %v1018_v18 = vpop.f32.mrb[12].mxu1 }
  0xfa   :  { %748 = vst.msk [vmem:[%s1679_s3 + $0x58] sm:$0xff] %vm736_vm2, %v683_v13  ;;  %780 = vst.msk [vmem:[%s1679_s3 + $0x158] sm:$0xff] %vm736_vm2, %v715_v14  ;;  %v419_v19 = vadd.f32 %v970_v17, %v1354_v7  ;;  %v579_v20 = vadd.f32 %v1018_v18, %v1354_v7  ;;  %v413_v21 = vpop.f32.mrb[13].mxu0  ;;  %v573_v22 = vpop.f32.mrb[13].mxu1 }
  0xfb   :  { %747 = vst.msk [vmem:[%s1679_s3 + $0x50] sm:$0xff] %vm736_vm2, %v682_v15  ;;  %779 = vst.msk [vmem:[%s1679_s3 + $0x150] sm:$0xff] %vm736_vm2, %v714_v16  ;;  %v414_v23 = vadd.f32 %v1354_v7, %v413_v21  ;;  %v574_v24 = vadd.f32 %v1354_v7, %v573_v22 }
  0xfc   :  { %v685_v25 = vmax.f32 %v419_v19, 0.0  ;;  %v717_v26 = vmax.f32 %v579_v20, 0.0 }
  0xfd   :  { %v684_v27 = vmax.f32 %v414_v23, 0.0  ;;  %v716_v28 = vmax.f32 %v574_v24, 0.0  ;;  %v973_v29 = vpop.f32.mrb[14].mxu0  ;;  %v1021_v30 = vpop.f32.mrb[14].mxu1 }
  0xfe   :  { %750 = vst.msk [vmem:[%s1679_s3 + $0x68] sm:$0xff] %vm736_vm2, %v685_v25  ;;  %782 = vst.msk [vmem:[%s1679_s3 + $0x168] sm:$0xff] %vm736_vm2, %v717_v26  ;;  %v429_v31 = vadd.f32 %v973_v29, %v1354_v7  ;;  %v589_v32 = vadd.f32 %v1021_v30, %v1354_v7  ;;  %v423_v33 = vpop.f32.mrb[15].mxu0  ;;  %v583_v34 = vpop.f32.mrb[15].mxu1 }
  0xff   :  { %749 = vst.msk [vmem:[%s1679_s3 + $0x60] sm:$0xff] %vm736_vm2, %v684_v27  ;;  %781 = vst.msk [vmem:[%s1679_s3 + $0x160] sm:$0xff] %vm736_vm2, %v716_v28  ;;  %v424_v35 = vadd.f32 %v1354_v7, %v423_v33  ;;  %v584_v36 = vadd.f32 %v1354_v7, %v583_v34 }
 0x100   :  { %v687_v37 = vmax.f32 %v429_v31, 0.0  ;;  %v719_v38 = vmax.f32 %v589_v32, 0.0 }
 0x101   :  { %v686_v39 = vmax.f32 %v424_v35, 0.0  ;;  %v718_v40 = vmax.f32 %v584_v36, 0.0  ;;  %v976_v41 = vpop.f32.mrb[16].mxu0  ;;  %v1024_v42 = vpop.f32.mrb[16].mxu1 }
 0x102   :  { %752 = vst.msk [vmem:[%s1679_s3 + $0x78] sm:$0xff] %vm736_vm2, %v687_v37  ;;  %784 = vst.msk [vmem:[%s1679_s3 + $0x178] sm:$0xff] %vm736_vm2, %v719_v38  ;;  %v439_v43 = vadd.f32 %v976_v41, %v1354_v7  ;;  %v599_v44 = vadd.f32 %v1024_v42, %v1354_v7  ;;  %v433_v45 = vpop.f32.mrb[17].mxu0  ;;  %v593_v46 = vpop.f32.mrb[17].mxu1 }
 0x103   :  { %751 = vst.msk [vmem:[%s1679_s3 + $0x70] sm:$0xff] %vm736_vm2, %v686_v39  ;;  %783 = vst.msk [vmem:[%s1679_s3 + $0x170] sm:$0xff] %vm736_vm2, %v718_v40  ;;  %v434_v47 = vadd.f32 %v1354_v7, %v433_v45  ;;  %v594_v48 = vadd.f32 %v1354_v7, %v593_v46 }
 0x104   :  { %v689_v49 = vmax.f32 %v439_v43, 0.0  ;;  %v721_v50 = vmax.f32 %v599_v44, 0.0 }
 0x105   :  { %v688_v51 = vmax.f32 %v434_v47, 0.0  ;;  %v720_v52 = vmax.f32 %v594_v48, 0.0  ;;  %v979_v53 = vpop.f32.mrb[18].mxu0  ;;  %v1027_v54 = vpop.f32.mrb[18].mxu1 }
 0x106   :  { %754 = vst.msk [vmem:[%s1679_s3 + $0x88] sm:$0xff] %vm736_vm2, %v689_v49  ;;  %786 = vst.msk [vmem:[%s1679_s3 + $0x188] sm:$0xff] %vm736_vm2, %v721_v50  ;;  %v449_v55 = vadd.f32 %v979_v53, %v1354_v7  ;;  %v609_v56 = vadd.f32 %v1027_v54, %v1354_v7  ;;  %v443_v57 = vpop.f32.mrb[19].mxu0  ;;  %v603_v58 = vpop.f32.mrb[19].mxu1 }
 0x107   :  { %753 = vst.msk [vmem:[%s1679_s3 + $0x80] sm:$0xff] %vm736_vm2, %v688_v51  ;;  %785 = vst.msk [vmem:[%s1679_s3 + $0x180] sm:$0xff] %vm736_vm2, %v720_v52  ;;  %v444_v59 = vadd.f32 %v1354_v7, %v443_v57  ;;  %v604_v60 = vadd.f32 %v1354_v7, %v603_v58 }
 0x108   :  { %v691_v61 = vmax.f32 %v449_v55, 0.0  ;;  %v723_v62 = vmax.f32 %v609_v56, 0.0 }
 0x109   :  { %v690_v63 = vmax.f32 %v444_v59, 0.0  ;;  %v722_v0 = vmax.f32 %v604_v60, 0.0  ;;  %v982_v1 = vpop.f32.mrb[20].mxu0  ;;  %v1030_v2 = vpop.f32.mrb[20].mxu1 }
 0x10a   :  { %756 = vst.msk [vmem:[%s1679_s3 + $0x98] sm:$0xff] %vm736_vm2, %v691_v61  ;;  %788 = vst.msk [vmem:[%s1679_s3 + $0x198] sm:$0xff] %vm736_vm2, %v723_v62  ;;  %v459_v3 = vadd.f32 %v982_v1, %v1354_v7  ;;  %v619_v4 = vadd.f32 %v1030_v2, %v1354_v7  ;;  %v453_v5 = vpop.f32.mrb[21].mxu0  ;;  %v613_v6 = vpop.f32.mrb[21].mxu1 }
 0x10b   :  { %755 = vst.msk [vmem:[%s1679_s3 + $0x90] sm:$0xff] %vm736_vm2, %v690_v63  ;;  %787 = vst.msk [vmem:[%s1679_s3 + $0x190] sm:$0xff] %vm736_vm2, %v722_v0  ;;  %v454_v8 = vadd.f32 %v1354_v7, %v453_v5  ;;  %v614_v9 = vadd.f32 %v1354_v7, %v613_v6 }
 0x10c   :  { %v693_v10 = vmax.f32 %v459_v3, 0.0  ;;  %v725_v11 = vmax.f32 %v619_v4, 0.0 }
 0x10d   :  { %v692_v12 = vmax.f32 %v454_v8, 0.0  ;;  %v724_v13 = vmax.f32 %v614_v9, 0.0  ;;  %v985_v14 = vpop.f32.mrb[22].mxu0  ;;  %v1033_v15 = vpop.f32.mrb[22].mxu1 }
 0x10e   :  { %758 = vst.msk [vmem:[%s1679_s3 + $0xa8] sm:$0xff] %vm736_vm2, %v693_v10  ;;  %790 = vst.msk [vmem:[%s1679_s3 + $0x1a8] sm:$0xff] %vm736_vm2, %v725_v11  ;;  %v469_v16 = vadd.f32 %v985_v14, %v1354_v7  ;;  %v629_v17 = vadd.f32 %v1033_v15, %v1354_v7  ;;  %v463_v18 = vpop.f32.mrb[23].mxu0  ;;  %v623_v19 = vpop.f32.mrb[23].mxu1 }
 0x10f   :  { %757 = vst.msk [vmem:[%s1679_s3 + $0xa0] sm:$0xff] %vm736_vm2, %v692_v12  ;;  %789 = vst.msk [vmem:[%s1679_s3 + $0x1a0] sm:$0xff] %vm736_vm2, %v724_v13  ;;  %v464_v20 = vadd.f32 %v1354_v7, %v463_v18  ;;  %v624_v21 = vadd.f32 %v1354_v7, %v623_v19 }
 0x110   :  { %v695_v22 = vmax.f32 %v469_v16, 0.0  ;;  %v727_v23 = vmax.f32 %v629_v17, 0.0 }
 0x111   :  { %v694_v24 = vmax.f32 %v464_v20, 0.0  ;;  %v726_v25 = vmax.f32 %v624_v21, 0.0  ;;  %v988_v26 = vpop.f32.mrb[24].mxu0  ;;  %v1036_v27 = vpop.f32.mrb[24].mxu1 }
 0x112   :  { %760 = vst.msk [vmem:[%s1679_s3 + $0xb8] sm:$0xff] %vm736_vm2, %v695_v22  ;;  %792 = vst.msk [vmem:[%s1679_s3 + $0x1b8] sm:$0xff] %vm736_vm2, %v727_v23  ;;  %v479_v28 = vadd.f32 %v988_v26, %v1354_v7  ;;  %v639_v29 = vadd.f32 %v1036_v27, %v1354_v7  ;;  %v473_v30 = vpop.f32.mrb[25].mxu0  ;;  %v633_v31 = vpop.f32.mrb[25].mxu1 }
 0x113   :  { %759 = vst.msk [vmem:[%s1679_s3 + $0xb0] sm:$0xff] %vm736_vm2, %v694_v24  ;;  %791 = vst.msk [vmem:[%s1679_s3 + $0x1b0] sm:$0xff] %vm736_vm2, %v726_v25  ;;  %v474_v32 = vadd.f32 %v1354_v7, %v473_v30  ;;  %v634_v33 = vadd.f32 %v1354_v7, %v633_v31 }
 0x114   :  { %v697_v34 = vmax.f32 %v479_v28, 0.0  ;;  %v729_v35 = vmax.f32 %v639_v29, 0.0 }
 0x115   :  { %v696_v36 = vmax.f32 %v474_v32, 0.0  ;;  %v728_v37 = vmax.f32 %v634_v33, 0.0  ;;  %v991_v38 = vpop.f32.mrb[26].mxu0  ;;  %v1039_v39 = vpop.f32.mrb[26].mxu1 }
 0x116   :  { %762 = vst.msk [vmem:[%s1679_s3 + $0xc8] sm:$0xff] %vm736_vm2, %v697_v34  ;;  %794 = vst.msk [vmem:[%s1679_s3 + $0x1c8] sm:$0xff] %vm736_vm2, %v729_v35  ;;  %v489_v40 = vadd.f32 %v991_v38, %v1354_v7  ;;  %v649_v41 = vadd.f32 %v1039_v39, %v1354_v7  ;;  %v483_v42 = vpop.f32.mrb[27].mxu0  ;;  %v643_v43 = vpop.f32.mrb[27].mxu1 }
 0x117   :  { %761 = vst.msk [vmem:[%s1679_s3 + $0xc0] sm:$0xff] %vm736_vm2, %v696_v36  ;;  %793 = vst.msk [vmem:[%s1679_s3 + $0x1c0] sm:$0xff] %vm736_vm2, %v728_v37  ;;  %v484_v44 = vadd.f32 %v1354_v7, %v483_v42  ;;  %v644_v45 = vadd.f32 %v1354_v7, %v643_v43 }
 0x118   :  { %v699_v46 = vmax.f32 %v489_v40, 0.0  ;;  %v731_v47 = vmax.f32 %v649_v41, 0.0 }
 0x119   :  { %v698_v48 = vmax.f32 %v484_v44, 0.0  ;;  %v730_v49 = vmax.f32 %v644_v45, 0.0  ;;  %v994_v50 = vpop.f32.mrb[28].mxu0  ;;  %v1042_v51 = vpop.f32.mrb[28].mxu1 }
 0x11a   :  { %764 = vst.msk [vmem:[%s1679_s3 + $0xd8] sm:$0xff] %vm736_vm2, %v699_v46  ;;  %796 = vst.msk [vmem:[%s1679_s3 + $0x1d8] sm:$0xff] %vm736_vm2, %v731_v47  ;;  %v499_v52 = vadd.f32 %v994_v50, %v1354_v7  ;;  %v659_v53 = vadd.f32 %v1042_v51, %v1354_v7  ;;  %v493_v54 = vpop.f32.mrb[29].mxu0  ;;  %v653_v55 = vpop.f32.mrb[29].mxu1 }
 0x11b   :  { %763 = vst.msk [vmem:[%s1679_s3 + $0xd0] sm:$0xff] %vm736_vm2, %v698_v48  ;;  %795 = vst.msk [vmem:[%s1679_s3 + $0x1d0] sm:$0xff] %vm736_vm2, %v730_v49  ;;  %v494_v56 = vadd.f32 %v1354_v7, %v493_v54  ;;  %v654_v57 = vadd.f32 %v1354_v7, %v653_v55 }
 0x11c   :  { %v701_v58 = vmax.f32 %v499_v52, 0.0  ;;  %v733_v59 = vmax.f32 %v659_v53, 0.0 }
 0x11d   :  { %v700_v60 = vmax.f32 %v494_v56, 0.0  ;;  %v732_v61 = vmax.f32 %v654_v57, 0.0  ;;  %v997_v62 = vpop.f32.mrb[30].mxu0  ;;  %v1045_v63 = vpop.f32.mrb[30].mxu1 }
 0x11e   :  { %766 = vst.msk [vmem:[%s1679_s3 + $0xe8] sm:$0xff] %vm736_vm2, %v701_v58  ;;  %798 = vst.msk [vmem:[%s1679_s3 + $0x1e8] sm:$0xff] %vm736_vm2, %v733_v59  ;;  %v509_v0 = vadd.f32 %v997_v62, %v1354_v7  ;;  %v669_v1 = vadd.f32 %v1045_v63, %v1354_v7  ;;  %v503_v2 = vpop.f32.mrb[31].mxu0  ;;  %v663_v3 = vpop.f32.mrb[31].mxu1 }
 0x11f   :  { %765 = vst.msk [vmem:[%s1679_s3 + $0xe0] sm:$0xff] %vm736_vm2, %v700_v60  ;;  %797 = vst.msk [vmem:[%s1679_s3 + $0x1e0] sm:$0xff] %vm736_vm2, %v732_v61  ;;  %v504_v4 = vadd.f32 %v1354_v7, %v503_v2  ;;  %v664_v5 = vadd.f32 %v1354_v7, %v663_v3 }
 0x120   :  { %v703_v6 = vmax.f32 %v509_v0, 0.0  ;;  %v735_v8 = vmax.f32 %v669_v1, 0.0 }
 0x121   :  { %v702_v9 = vmax.f32 %v504_v4, 0.0  ;;  %v734_v10 = vmax.f32 %v664_v5, 0.0 }
 0x122   :  { %768 = vst.msk [vmem:[%s1679_s3 + $0xf8] sm:$0xff] %vm736_vm2, %v703_v6  ;;  %800 = vst.msk [vmem:[%s1679_s3 + $0x1f8] sm:$0xff] %vm736_vm2, %v735_v8 }
 0x123   :  { %767 = vst.msk [vmem:[%s1679_s3 + $0xf0] sm:$0xff] %vm736_vm2, %v702_v9  ;;  %799 = vst.msk [vmem:[%s1679_s3 + $0x1f0] sm:$0xff] %vm736_vm2, %v734_v10 }

// kernel: lfb_forward.6
= control target key start
LH: loop header
LB: loop body
LE: loop exit
PB: predicated region body
PF: predicated region fallthrough
CT: control target
= control target key end

     0   :  { %10 = vsyncpa [#allocation3], 0  ;;  %s2281_s0 = inlined_call_operand.vmem [shape: f32[2], index: 0, kind: input, shape index: {}]   ;;  %s2282_s1 = inlined_call_operand.vmem [shape: f32[512,72], index: 1, kind: input, shape index: {}]   ;;  %s2283_s2 = inlined_call_operand.vmem [shape: f32[72,4], index: 2, kind: input, shape index: {}]   ;;  %s2284_s3 = inlined_call_operand.vmem [shape: f32[1,4], index: 3, kind: input, shape index: {}]   ;;  %s2285_s4 = inlined_call_operand.vmem [shape: f32[512,4], index: 4, kind: input, shape index: {}]   ;;  %s2286_s5 = inlined_call_operand.vmem [shape: f32[512,4], index: 5, kind: output, shape index: {}]  }
   0x1   :  { %s17_s20 = sshll.u32 %s2281_s0, 4  ;;  %s18_s20 = int_to_ptr.vmem [resolvable:$true] %s17_s20 }
   0x2   :  { %s1301_s21 = scalar_lea.vmem %s18_s20, 16  ;;  %p1306_p1 = scmp.lt.s32.totalorder %s18_s20, %s18_s20 }
   0x3   :  { %p1302_p0 = scmp.ne.s32.totalorder %s18_s20, %s1301_s21  ;;  %p1307_p2 = scmp.lt.s32.totalorder %s1301_s21, %s1301_s21 }
   0x5   :  { %p1308_p3 = por %p1307_p2, %p1306_p1 }
   0x7   :  { %p1309_p4 = pnand %p1308_p3, %p1302_p0 }
   0x9   :  { %1312 = shalt.err (!%p1309_p4)
}
   0xa   :  { %s1315_s22 = smov [#allocation2]  }
   0xb   :  { %20 = dma.vmem_to_smem %s18_s20, 16, %s1315_s22, [#allocation3]  }
   0xc   :  { %1313 = dma.done.wait [#allocation3], 16  }
   0xd   :  { %1314 = vsyncadd [#allocation3], 4294967280 }
   0xe   :  { %32 = sfence }
   0xf   :  { %v97_v0 = vld [vmem:[%s2283_s2] sm:$0xff]  ;;  %v98_v1 = vld [vmem:[%s2283_s2 + $0x8] sm:$0xff]  ;;  %v99_v2 = vld [vmem:[%s2283_s2 + $0x10] sm:$0xff]  ;;  %vm113_vm0 = vcmask 588800   ;;  %s1086_s8 = sld [smem:[#allocation2 + $0x1]]  ;;  %s691_s9 = sld [smem:[#allocation2]] }
  0x10   :  { %v1274_v3 = vpack.c.bf16 %v98_v1, %v97_v0  ;;  %v100_v4 = vld [vmem:[%s2283_s2 + $0x18] sm:$0xff]  ;;  %v101_v6 = vld [vmem:[%s2283_s2 + $0x20] sm:$0xff]  ;;  %v102_v7 = vld [vmem:[%s2283_s2 + $0x28] sm:$0xff]  ;;  %vm951_vm1 = vcmask 31744  }
  0x11   :  { %v1278_v5 = vpack.c.bf16 %v100_v4, %v99_v2  ;;  %v33_v8 = vld [vmem:[%s2282_s1] sm:$0xff]  ;;  %v1282_v10 = vpack.c.bf16 %v102_v7, %v101_v6  ;;  %v103_v11 = vld [vmem:[%s2283_s2 + $0x30] sm:$0xff]  ;;  %v104_v12 = vld [vmem:[%s2283_s2 + $0x38] sm:$0xff] }
  0x12   :  { %1275 = vmatprep.subr.bf16.mxu0 %v1274_v3  ;;  %1290 = vmatprep.subr.bf16.mxu1 %v1274_v3  ;;  %v65_v9 = vld [vmem:[%s2282_s1 + $0x100] sm:$0xff]  ;;  %v1286_v13 = vpack.c.bf16 %v104_v12, %v103_v11  ;;  %v34_v15 = vld [vmem:[%s2282_s1 + $0x8] sm:$0xff]  ;;  %v35_v17 = vld [vmem:[%s2282_s1 + $0x10] sm:$0xff] }
  0x13   :  { %1277 = vmatpush3.bf16.msra.mxu0 %v1274_v3  ;;  %1295 = vmatpush3.bf16.msra.mxu1 %v1274_v3  ;;  %v105_v14 = vld [vmem:[%s2283_s2 + $0x40] sm:$0xff]  ;;  %v66_v16 = vld [vmem:[%s2282_s1 + $0x108] sm:$0xff]  ;;  %v67_v18 = vld [vmem:[%s2282_s1 + $0x110] sm:$0xff] }
  0x14   :  { %1279 = vmatprep.subr.bf16.mxu0 %v1278_v5  ;;  %1291 = vmatprep.subr.bf16.mxu1 %v1278_v5  ;;  %v36_v19 = vld [vmem:[%s2282_s1 + $0x18] sm:$0xff]  ;;  %v37_v21 = vld [vmem:[%s2282_s1 + $0x20] sm:$0xff]  ;;  %v38_v23 = vld [vmem:[%s2282_s1 + $0x28] sm:$0xff] }
  0x15   :  { %1178 = vmatprep.mubr.msk.f32.mxu0 %vm113_vm0, %v33_v8  ;;  %1226 = vmatprep.mubr.msk.f32.mxu1 %vm113_vm0, %v65_v9  ;;  %v68_v20 = vld [vmem:[%s2282_s1 + $0x118] sm:$0xff]  ;;  %v69_v22 = vld [vmem:[%s2282_s1 + $0x120] sm:$0xff]  ;;  %v70_v24 = vld [vmem:[%s2282_s1 + $0x128] sm:$0xff] }
  0x16   :  { %v39_v25 = vld [vmem:[%s2282_s1 + $0x30] sm:$0xff]  ;;  %v40_v27 = vld [vmem:[%s2282_s1 + $0x38] sm:$0xff]  ;;  %v41_v29 = vld [vmem:[%s2282_s1 + $0x40] sm:$0xff] }
  0x17   :  { %1281 = vmatpush3.bf16.msra.mxu0 %v1278_v5  ;;  %1296 = vmatpush3.bf16.msra.mxu1 %v1278_v5  ;;  %v71_v26 = vld [vmem:[%s2282_s1 + $0x130] sm:$0xff]  ;;  %v72_v28 = vld [vmem:[%s2282_s1 + $0x138] sm:$0xff]  ;;  %v73_v30 = vld [vmem:[%s2282_s1 + $0x140] sm:$0xff] }
  0x18   :  { %1283 = vmatprep.subr.bf16.mxu0 %v1282_v10  ;;  %1292 = vmatprep.subr.bf16.mxu1 %v1282_v10  ;;  %v42_v31 = vld [vmem:[%s2282_s1 + $0x48] sm:$0xff]  ;;  %v43_v33 = vld [vmem:[%s2282_s1 + $0x50] sm:$0xff]  ;;  %v44_v35 = vld [vmem:[%s2282_s1 + $0x58] sm:$0xff] }
  0x19   :  { %v74_v32 = vld [vmem:[%s2282_s1 + $0x148] sm:$0xff]  ;;  %v75_v34 = vld [vmem:[%s2282_s1 + $0x150] sm:$0xff]  ;;  %v76_v36 = vld [vmem:[%s2282_s1 + $0x158] sm:$0xff] }
  0x1a   :  { %v45_v37 = vld [vmem:[%s2282_s1 + $0x60] sm:$0xff]  ;;  %v46_v39 = vld [vmem:[%s2282_s1 + $0x68] sm:$0xff]  ;;  %v47_v41 = vld [vmem:[%s2282_s1 + $0x70] sm:$0xff] }
  0x1b   :  { %1285 = vmatpush3.bf16.msra.mxu0 %v1282_v10  ;;  %1297 = vmatpush3.bf16.msra.mxu1 %v1282_v10  ;;  %v77_v38 = vld [vmem:[%s2282_s1 + $0x160] sm:$0xff]  ;;  %v78_v40 = vld [vmem:[%s2282_s1 + $0x168] sm:$0xff]  ;;  %v79_v42 = vld [vmem:[%s2282_s1 + $0x170] sm:$0xff] }
  0x1c   :  { %1287 = vmatprep.subr.bf16.mxu0 %v1286_v13  ;;  %1293 = vmatprep.subr.bf16.mxu1 %v1286_v13  ;;  %v48_v43 = vld [vmem:[%s2282_s1 + $0x78] sm:$0xff]  ;;  %v49_v45 = vld [vmem:[%s2282_s1 + $0x80] sm:$0xff]  ;;  %v50_v47 = vld [vmem:[%s2282_s1 + $0x88] sm:$0xff] }
  0x1d   :  { %v80_v44 = vld [vmem:[%s2282_s1 + $0x178] sm:$0xff]  ;;  %v81_v46 = vld [vmem:[%s2282_s1 + $0x180] sm:$0xff]  ;;  %v82_v48 = vld [vmem:[%s2282_s1 + $0x188] sm:$0xff] }
  0x1e   :  { %v51_v49 = vld [vmem:[%s2282_s1 + $0x90] sm:$0xff]  ;;  %v52_v51 = vld [vmem:[%s2282_s1 + $0x98] sm:$0xff]  ;;  %v53_v53 = vld [vmem:[%s2282_s1 + $0xa0] sm:$0xff] }
  0x1f   :  { %1289 = vmatpush3.bf16.msra.mxu0 %v1286_v13  ;;  %1298 = vmatpush3.bf16.msra.mxu1 %v1286_v13  ;;  %v83_v50 = vld [vmem:[%s2282_s1 + $0x190] sm:$0xff]  ;;  %v84_v52 = vld [vmem:[%s2282_s1 + $0x198] sm:$0xff]  ;;  %v85_v54 = vld [vmem:[%s2282_s1 + $0x1a0] sm:$0xff] }
  0x20   :  { %1176 = vmatprep.subr.mxu0 %v105_v14  ;;  %1294 = vmatprep.subr.mxu1 %v105_v14  ;;  %v54_v55 = vld [vmem:[%s2282_s1 + $0xa8] sm:$0xff]  ;;  %v55_v57 = vld [vmem:[%s2282_s1 + $0xb0] sm:$0xff]  ;;  %v56_v59 = vld [vmem:[%s2282_s1 + $0xb8] sm:$0xff] }
  0x21   :  { %v86_v56 = vld [vmem:[%s2282_s1 + $0x1a8] sm:$0xff]  ;;  %v87_v58 = vld [vmem:[%s2282_s1 + $0x1b0] sm:$0xff]  ;;  %v88_v60 = vld [vmem:[%s2282_s1 + $0x1b8] sm:$0xff] }
  0x22   :  { %v57_v61 = vld [vmem:[%s2282_s1 + $0xc0] sm:$0xff]  ;;  %v58_v63 = vld [vmem:[%s2282_s1 + $0xc8] sm:$0xff]  ;;  %v59_v1 = vld [vmem:[%s2282_s1 + $0xd0] sm:$0xff] }
  0x23   :  { %1177 = vmatpush3.msra.mxu0 %v105_v14  ;;  %1299 = vmatpush3.msra.mxu1 %v105_v14  ;;  %v89_v62 = vld [vmem:[%s2282_s1 + $0x1c0] sm:$0xff]  ;;  %v90_v0 = vld [vmem:[%s2282_s1 + $0x1c8] sm:$0xff]  ;;  %v91_v2 = vld [vmem:[%s2282_s1 + $0x1d0] sm:$0xff]  ;;  %v1635_v14 = vstv %s1086_s8 }
  0x24   :  { %1179 = vmatmul.mubr.msk.f32.vlgmr.msra.gmra.mrb[0].mxu0 %vm113_vm0, %v34_v15  ;;  %1227 = vmatmul.mubr.msk.f32.vlgmr.msra.gmra.mrb[0].mxu1 %vm113_vm0, %v66_v16  ;;  %v60_v3 = vld [vmem:[%s2282_s1 + $0xd8] sm:$0xff]  ;;  %v61_v5 = vld [vmem:[%s2282_s1 + $0xe0] sm:$0xff]  ;;  %v62_v7 = vld [vmem:[%s2282_s1 + $0xe8] sm:$0xff] }
  0x25   :  { %1181 = vmatprep.mubr.msk.f32.mxu0 %vm113_vm0, %v35_v17  ;;  %1229 = vmatprep.mubr.msk.f32.mxu1 %vm113_vm0, %v67_v18  ;;  %v92_v4 = vld [vmem:[%s2282_s1 + $0x1d8] sm:$0xff]  ;;  %v93_v6 = vld [vmem:[%s2282_s1 + $0x1e0] sm:$0xff]  ;;  %v94_v8 = vld [vmem:[%s2282_s1 + $0x1e8] sm:$0xff] }
  0x26   :  { %v63_v9 = vld [vmem:[%s2282_s1 + $0xf0] sm:$0xff]  ;;  %v64_v11 = vld [vmem:[%s2282_s1 + $0xf8] sm:$0xff]  ;;  %v759_v13 = vld [vmem:[%s2285_s4 + $0x8] sm:$0xff] }
  0x27   :  { %v95_v10 = vld [vmem:[%s2282_s1 + $0x1f0] sm:$0xff]  ;;  %v96_v12 = vld [vmem:[%s2282_s1 + $0x1f8] sm:$0xff]  ;;  %v1640_v15 = vld [vmem:[%s2284_s3] ss:$0 sm:$0xff] }
  0x28   :  { %1182 = vmatmul.mubr.msk.f32.gmra.mrb[2].mxu0 %vm113_vm0, %v36_v19  ;;  %1230 = vmatmul.mubr.msk.f32.gmra.mrb[2].mxu1 %vm113_vm0, %v68_v20  ;;  %v791_v16 = vld [vmem:[%s2285_s4 + $0x108] sm:$0xff]  ;;  %v758_v17 = vld [vmem:[%s2285_s4] sm:$0xff]  ;;  %v1651_v20 = vstv %s691_s9 }
  0x29   :  { %1184 = vmatprep.mubr.msk.f32.mxu0 %vm113_vm0, %v37_v21  ;;  %1232 = vmatprep.mubr.msk.f32.mxu1 %vm113_vm0, %v69_v22  ;;  %v790_v18 = vld [vmem:[%s2285_s4 + $0x100] sm:$0xff]  ;;  %v824_v21 = vmul.f32 %v1635_v14, %v759_v13 }
  0x2c   :  { %1185 = vmatmul.mubr.msk.f32.gmra.mrb[4].mxu0 %vm113_vm0, %v38_v23  ;;  %1233 = vmatmul.mubr.msk.f32.gmra.mrb[4].mxu1 %vm113_vm0, %v70_v24  ;;  %v761_v23 = vld [vmem:[%s2285_s4 + $0x18] sm:$0xff] }
  0x2d   :  { %1187 = vmatprep.mubr.msk.f32.mxu0 %vm113_vm0, %v39_v25  ;;  %1235 = vmatprep.mubr.msk.f32.mxu1 %vm113_vm0, %v71_v26  ;;  %v793_v24 = vld [vmem:[%s2285_s4 + $0x118] sm:$0xff] }
  0x30   :  { %1188 = vmatmul.mubr.msk.f32.gmra.mrb[6].mxu0 %vm113_vm0, %v40_v27  ;;  %1236 = vmatmul.mubr.msk.f32.gmra.mrb[6].mxu1 %vm113_vm0, %v72_v28  ;;  %v856_v27 = vmul.f32 %v1635_v14, %v791_v16  ;;  %v764_v16 = vld [vmem:[%s2285_s4 + $0x30] sm:$0xff] }
  0x31   :  { %1190 = vmatprep.mubr.msk.f32.mxu0 %vm113_vm0, %v41_v29  ;;  %1238 = vmatprep.mubr.msk.f32.mxu1 %vm113_vm0, %v73_v30  ;;  %v823_v29 = vmul.f32 %v1635_v14, %v758_v17  ;;  %v796_v17 = vld [vmem:[%s2285_s4 + $0x130] sm:$0xff] }
  0x34   :  { %1191 = vmatmul.mubr.msk.f32.gmra.mrb[8].mxu0 %vm113_vm0, %v42_v31  ;;  %1239 = vmatmul.mubr.msk.f32.gmra.mrb[8].mxu1 %vm113_vm0, %v74_v32  ;;  %v760_v31 = vld [vmem:[%s2285_s4 + $0x10] sm:$0xff] }
  0x35   :  { %1193 = vmatprep.mubr.msk.f32.mxu0 %vm113_vm0, %v43_v33  ;;  %1241 = vmatprep.mubr.msk.f32.mxu1 %vm113_vm0, %v75_v34  ;;  %v792_v32 = vld [vmem:[%s2285_s4 + $0x110] sm:$0xff] }
  0x38   :  { %1194 = vmatmul.mubr.msk.f32.gmra.mrb[10].mxu0 %vm113_vm0, %v44_v35  ;;  %1242 = vmatmul.mubr.msk.f32.gmra.mrb[10].mxu1 %vm113_vm0, %v76_v36  ;;  %v855_v35 = vmul.f32 %v1635_v14, %v790_v18 }
  0x39   :  { %1196 = vmatprep.mubr.msk.f32.mxu0 %vm113_vm0, %v45_v37  ;;  %1244 = vmatprep.mubr.msk.f32.mxu1 %vm113_vm0, %v77_v38  ;;  %v826_v38 = vmul.f32 %v1635_v14, %v761_v23 }
  0x3c   :  { %1197 = vmatmul.mubr.msk.f32.gmra.mrb[12].mxu0 %vm113_vm0, %v46_v39  ;;  %1245 = vmatmul.mubr.msk.f32.gmra.mrb[12].mxu1 %vm113_vm0, %v78_v40  ;;  %v858_v39 = vmul.f32 %v1635_v14, %v793_v24 }
  0x3d   :  { %1199 = vmatprep.mubr.msk.f32.mxu0 %vm113_vm0, %v47_v41  ;;  %1247 = vmatprep.mubr.msk.f32.mxu1 %vm113_vm0, %v79_v42 }
  0x40   :  { %1200 = vmatmul.mubr.msk.f32.gmra.mrb[14].mxu0 %vm113_vm0, %v48_v43  ;;  %1248 = vmatmul.mubr.msk.f32.gmra.mrb[14].mxu1 %vm113_vm0, %v80_v44  ;;  %v825_v44 = vmul.f32 %v1635_v14, %v760_v31  ;;  %v829_v31 = vmul.f32 %v1635_v14, %v764_v16 }
  0x41   :  { %1202 = vmatprep.mubr.msk.f32.mxu0 %vm113_vm0, %v49_v45  ;;  %1250 = vmatprep.mubr.msk.f32.mxu1 %vm113_vm0, %v81_v46  ;;  %v857_v45 = vmul.f32 %v1635_v14, %v792_v32  ;;  %v763_v46 = vld [vmem:[%s2285_s4 + $0x28] sm:$0xff]  ;;  %v861_v32 = vmul.f32 %v1635_v14, %v796_v17 }
  0x44   :  { %1203 = vmatmul.mubr.msk.f32.gmra.mrb[16].mxu0 %vm113_vm0, %v50_v47  ;;  %1251 = vmatmul.mubr.msk.f32.gmra.mrb[16].mxu1 %vm113_vm0, %v82_v48  ;;  %v795_v47 = vld [vmem:[%s2285_s4 + $0x128] sm:$0xff] }
  0x45   :  { %1205 = vmatprep.mubr.msk.f32.mxu0 %vm113_vm0, %v51_v49  ;;  %1253 = vmatprep.mubr.msk.f32.mxu1 %vm113_vm0, %v83_v50 }
  0x48   :  { %1206 = vmatmul.mubr.msk.f32.gmra.mrb[18].mxu0 %vm113_vm0, %v52_v51  ;;  %1254 = vmatmul.mubr.msk.f32.gmra.mrb[18].mxu1 %vm113_vm0, %v84_v52 }
  0x49   :  { %1208 = vmatprep.mubr.msk.f32.mxu0 %vm113_vm0, %v53_v53  ;;  %1256 = vmatprep.mubr.msk.f32.mxu1 %vm113_vm0, %v85_v54  ;;  %v762_v54 = vld [vmem:[%s2285_s4 + $0x20] sm:$0xff] }
  0x4c   :  { %1209 = vmatmul.mubr.msk.f32.gmra.mrb[20].mxu0 %vm113_vm0, %v54_v55  ;;  %1257 = vmatmul.mubr.msk.f32.gmra.mrb[20].mxu1 %vm113_vm0, %v86_v56  ;;  %v794_v55 = vld [vmem:[%s2285_s4 + $0x120] sm:$0xff] }
  0x4d   :  { %1211 = vmatprep.mubr.msk.f32.mxu0 %vm113_vm0, %v55_v57  ;;  %1259 = vmatprep.mubr.msk.f32.mxu1 %vm113_vm0, %v87_v58 }
  0x50   :  { %1212 = vmatmul.mubr.msk.f32.gmra.mrb[22].mxu0 %vm113_vm0, %v56_v59  ;;  %1260 = vmatmul.mubr.msk.f32.gmra.mrb[22].mxu1 %vm113_vm0, %v88_v60 }
  0x51   :  { %1214 = vmatprep.mubr.msk.f32.mxu0 %vm113_vm0, %v57_v61  ;;  %1262 = vmatprep.mubr.msk.f32.mxu1 %vm113_vm0, %v89_v62  ;;  %v828_v62 = vmul.f32 %v1635_v14, %v763_v46 }
  0x54   :  { %1215 = vmatmul.mubr.msk.f32.gmra.mrb[24].mxu0 %vm113_vm0, %v58_v63  ;;  %1263 = vmatmul.mubr.msk.f32.gmra.mrb[24].mxu1 %vm113_vm0, %v90_v0  ;;  %v860_v63 = vmul.f32 %v1635_v14, %v795_v47 }
  0x55   :  { %1217 = vmatprep.mubr.msk.f32.mxu0 %vm113_vm0, %v59_v1  ;;  %1265 = vmatprep.mubr.msk.f32.mxu1 %vm113_vm0, %v91_v2 }
  0x58   :  { %1218 = vmatmul.mubr.msk.f32.gmra.mrb[26].mxu0 %vm113_vm0, %v60_v3  ;;  %1266 = vmatmul.mubr.msk.f32.gmra.mrb[26].mxu1 %vm113_vm0, %v92_v4  ;;  %v827_v4 = vmul.f32 %v1635_v14, %v762_v54 }
  0x59   :  { %1220 = vmatprep.mubr.msk.f32.mxu0 %vm113_vm0, %v61_v5  ;;  %1268 = vmatprep.mubr.msk.f32.mxu1 %vm113_vm0, %v93_v6  ;;  %v859_v5 = vmul.f32 %v1635_v14, %v794_v55  ;;  %v765_v6 = vld [vmem:[%s2285_s4 + $0x38] sm:$0xff] }
  0x5c   :  { %1221 = vmatmul.mubr.msk.f32.gmra.mrb[28].mxu0 %vm113_vm0, %v62_v7  ;;  %1269 = vmatmul.mubr.msk.f32.gmra.mrb[28].mxu1 %vm113_vm0, %v94_v8  ;;  %v797_v7 = vld [vmem:[%s2285_s4 + $0x138] sm:$0xff] }
  0x5d   :  { %1223 = vmatprep.mubr.msk.f32.mxu0 %vm113_vm0, %v63_v9  ;;  %1271 = vmatprep.mubr.msk.f32.mxu1 %vm113_vm0, %v95_v10 }
  0x60   :  { %1224 = vmatmul.mubr.msk.f32.gmra.mrb[30].mxu0 %vm113_vm0, %v64_v11  ;;  %1272 = vmatmul.mubr.msk.f32.gmra.mrb[30].mxu1 %vm113_vm0, %v96_v12 }
  0xf7   :  { %v1180_v19 = vpop.f32.mrb[0].mxu0  ;;  %v1228_v22 = vpop.f32.mrb[0].mxu1 }
  0xf8   :  { %v378_v25 = vadd.f32 %v1180_v19, %v1640_v15  ;;  %v538_v26 = vadd.f32 %v1228_v22, %v1640_v15  ;;  %v372_v28 = vpop.f32.mrb[1].mxu0  ;;  %v532_v30 = vpop.f32.mrb[1].mxu1 }
  0xf9   :  { %v373_v33 = vadd.f32 %v1640_v15, %v372_v28  ;;  %v533_v34 = vadd.f32 %v1640_v15, %v532_v30 }
  0xfa   :  { %v694_v36 = vmul.f32 %v1651_v20, %v378_v25  ;;  %v726_v37 = vmul.f32 %v1651_v20, %v538_v26  ;;  %v830_v25 = vmul.f32 %v1635_v14, %v765_v6  ;;  %v862_v26 = vmul.f32 %v1635_v14, %v797_v7 }
  0xfb   :  { %v693_v40 = vmul.f32 %v1651_v20, %v373_v33  ;;  %v725_v41 = vmul.f32 %v1651_v20, %v533_v34  ;;  %v1183_v42 = vpop.f32.mrb[2].mxu0  ;;  %v1231_v43 = vpop.f32.mrb[2].mxu1  ;;  %v767_v33 = vld [vmem:[%s2285_s4 + $0x48] sm:$0xff] }
  0xfc   :  { %v888_v48 = vadd.f32 %v824_v21, %v694_v36  ;;  %v920_v49 = vadd.f32 %v856_v27, %v726_v37  ;;  %v388_v50 = vadd.f32 %v1183_v42, %v1640_v15  ;;  %v548_v51 = vadd.f32 %v1231_v43, %v1640_v15  ;;  %v382_v52 = vpop.f32.mrb[3].mxu0  ;;  %v542_v53 = vpop.f32.mrb[3].mxu1  ;;  %v799_v34 = vld [vmem:[%s2285_s4 + $0x148] sm:$0xff]  ;;  %v798_v42 = vld [vmem:[%s2285_s4 + $0x140] sm:$0xff] }
  0xfd   :  { %v887_v56 = vadd.f32 %v823_v29, %v693_v40  ;;  %v919_v57 = vadd.f32 %v855_v35, %v725_v41  ;;  %v383_v58 = vadd.f32 %v1640_v15, %v382_v52  ;;  %v543_v59 = vadd.f32 %v1640_v15, %v542_v53  ;;  %v766_v41 = vld [vmem:[%s2285_s4 + $0x40] sm:$0xff] }
  0xfe   :  { %953 = vst.msk [vmem:[%s2286_s5 + $0x8] sm:$0xff] %vm951_vm1, %v888_v48  ;;  %985 = vst.msk [vmem:[%s2286_s5 + $0x108] sm:$0xff] %vm951_vm1, %v920_v49  ;;  %v696_v60 = vmul.f32 %v1651_v20, %v388_v50  ;;  %v728_v61 = vmul.f32 %v1651_v20, %v548_v51  ;;  %v832_v49 = vmul.f32 %v1635_v14, %v767_v33 }
  0xff   :  { %952 = vst.msk [vmem:[%s2286_s5] sm:$0xff] %vm951_vm1, %v887_v56  ;;  %984 = vst.msk [vmem:[%s2286_s5 + $0x100] sm:$0xff] %vm951_vm1, %v919_v57  ;;  %v695_v0 = vmul.f32 %v1651_v20, %v383_v58  ;;  %v727_v1 = vmul.f32 %v1651_v20, %v543_v59  ;;  %v1186_v2 = vpop.f32.mrb[4].mxu0  ;;  %v1234_v3 = vpop.f32.mrb[4].mxu1  ;;  %v864_v50 = vmul.f32 %v1635_v14, %v799_v34  ;;  %v769_v57 = vld [vmem:[%s2285_s4 + $0x58] sm:$0xff] }
 0x100   :  { %v890_v8 = vadd.f32 %v826_v38, %v696_v60  ;;  %v922_v9 = vadd.f32 %v858_v39, %v728_v61  ;;  %v398_v10 = vadd.f32 %v1186_v2, %v1640_v15  ;;  %v558_v11 = vadd.f32 %v1234_v3, %v1640_v15  ;;  %v392_v12 = vpop.f32.mrb[5].mxu0  ;;  %v552_v13 = vpop.f32.mrb[5].mxu1  ;;  %v801_v58 = vld [vmem:[%s2285_s4 + $0x158] sm:$0xff]  ;;  %v800_v2 = vld [vmem:[%s2285_s4 + $0x150] sm:$0xff] }
 0x101   :  { %v889_v18 = vadd.f32 %v825_v44, %v695_v0  ;;  %v921_v19 = vadd.f32 %v857_v45, %v727_v1  ;;  %v393_v21 = vadd.f32 %v1640_v15, %v392_v12  ;;  %v553_v22 = vadd.f32 %v1640_v15, %v552_v13  ;;  %v768_v1 = vld [vmem:[%s2285_s4 + $0x50] sm:$0xff] }
 0x102   :  { %955 = vst.msk [vmem:[%s2286_s5 + $0x18] sm:$0xff] %vm951_vm1, %v890_v8  ;;  %987 = vst.msk [vmem:[%s2286_s5 + $0x118] sm:$0xff] %vm951_vm1, %v922_v9  ;;  %v698_v23 = vmul.f32 %v1651_v20, %v398_v10  ;;  %v730_v24 = vmul.f32 %v1651_v20, %v558_v11  ;;  %v831_v55 = vmul.f32 %v1635_v14, %v766_v41 }
 0x103   :  { %954 = vst.msk [vmem:[%s2286_s5 + $0x10] sm:$0xff] %vm951_vm1, %v889_v18  ;;  %986 = vst.msk [vmem:[%s2286_s5 + $0x110] sm:$0xff] %vm951_vm1, %v921_v19  ;;  %v697_v27 = vmul.f32 %v1651_v20, %v393_v21  ;;  %v729_v28 = vmul.f32 %v1651_v20, %v553_v22  ;;  %v1189_v29 = vpop.f32.mrb[6].mxu0  ;;  %v1237_v30 = vpop.f32.mrb[6].mxu1  ;;  %v863_v56 = vmul.f32 %v1635_v14, %v798_v42  ;;  %v771_v19 = vld [vmem:[%s2285_s4 + $0x68] sm:$0xff] }
 0x104   :  { %v892_v35 = vadd.f32 %v828_v62, %v698_v23  ;;  %v924_v36 = vadd.f32 %v860_v63, %v730_v24  ;;  %v408_v37 = vadd.f32 %v1189_v29, %v1640_v15  ;;  %v568_v38 = vadd.f32 %v1237_v30, %v1640_v15  ;;  %v402_v39 = vpop.f32.mrb[7].mxu0  ;;  %v562_v40 = vpop.f32.mrb[7].mxu1  ;;  %v803_v21 = vld [vmem:[%s2285_s4 + $0x168] sm:$0xff]  ;;  %v802_v29 = vld [vmem:[%s2285_s4 + $0x160] sm:$0xff] }
 0x105   :  { %v891_v43 = vadd.f32 %v827_v4, %v697_v27  ;;  %v923_v44 = vadd.f32 %v859_v5, %v729_v28  ;;  %v403_v45 = vadd.f32 %v1640_v15, %v402_v39  ;;  %v563_v46 = vadd.f32 %v1640_v15, %v562_v40  ;;  %v770_v28 = vld [vmem:[%s2285_s4 + $0x60] sm:$0xff] }
 0x106   :  { %957 = vst.msk [vmem:[%s2286_s5 + $0x28] sm:$0xff] %vm951_vm1, %v892_v35  ;;  %989 = vst.msk [vmem:[%s2286_s5 + $0x128] sm:$0xff] %vm951_vm1, %v924_v36  ;;  %v700_v47 = vmul.f32 %v1651_v20, %v408_v37  ;;  %v732_v48 = vmul.f32 %v1651_v20, %v568_v38  ;;  %v834_v9 = vmul.f32 %v1635_v14, %v769_v57 }
 0x107   :  { %956 = vst.msk [vmem:[%s2286_s5 + $0x20] sm:$0xff] %vm951_vm1, %v891_v43  ;;  %988 = vst.msk [vmem:[%s2286_s5 + $0x120] sm:$0xff] %vm951_vm1, %v923_v44  ;;  %v699_v51 = vmul.f32 %v1651_v20, %v403_v45  ;;  %v731_v52 = vmul.f32 %v1651_v20, %v563_v46  ;;  %v1192_v53 = vpop.f32.mrb[8].mxu0  ;;  %v1240_v54 = vpop.f32.mrb[8].mxu1  ;;  %v866_v10 = vmul.f32 %v1635_v14, %v801_v58  ;;  %v773_v44 = vld [vmem:[%s2285_s4 + $0x78] sm:$0xff] }
 0x108   :  { %v894_v59 = vadd.f32 %v830_v25, %v700_v47  ;;  %v926_v60 = vadd.f32 %v862_v26, %v732_v48  ;;  %v418_v61 = vadd.f32 %v1192_v53, %v1640_v15  ;;  %v578_v62 = vadd.f32 %v1240_v54, %v1640_v15  ;;  %v412_v63 = vpop.f32.mrb[9].mxu0  ;;  %v572_v0 = vpop.f32.mrb[9].mxu1  ;;  %v805_v45 = vld [vmem:[%s2285_s4 + $0x178] sm:$0xff]  ;;  %v804_v53 = vld [vmem:[%s2285_s4 + $0x170] sm:$0xff] }
 0x109   :  { %v893_v3 = vadd.f32 %v829_v31, %v699_v51  ;;  %v925_v4 = vadd.f32 %v861_v32, %v731_v52  ;;  %v413_v5 = vadd.f32 %v1640_v15, %v412_v63  ;;  %v573_v6 = vadd.f32 %v1640_v15, %v572_v0  ;;  %v772_v52 = vld [vmem:[%s2285_s4 + $0x70] sm:$0xff] }
 0x10a   :  { %959 = vst.msk [vmem:[%s2286_s5 + $0x38] sm:$0xff] %vm951_vm1, %v894_v59  ;;  %991 = vst.msk [vmem:[%s2286_s5 + $0x138] sm:$0xff] %vm951_vm1, %v926_v60  ;;  %v702_v7 = vmul.f32 %v1651_v20, %v418_v61  ;;  %v734_v8 = vmul.f32 %v1651_v20, %v578_v62  ;;  %v833_v17 = vmul.f32 %v1635_v14, %v768_v1 }
 0x10b   :  { %958 = vst.msk [vmem:[%s2286_s5 + $0x30] sm:$0xff] %vm951_vm1, %v893_v3  ;;  %990 = vst.msk [vmem:[%s2286_s5 + $0x130] sm:$0xff] %vm951_vm1, %v925_v4  ;;  %v701_v11 = vmul.f32 %v1651_v20, %v413_v5  ;;  %v733_v12 = vmul.f32 %v1651_v20, %v573_v6  ;;  %v1195_v13 = vpop.f32.mrb[10].mxu0  ;;  %v1243_v16 = vpop.f32.mrb[10].mxu1  ;;  %v865_v18 = vmul.f32 %v1635_v14, %v800_v2  ;;  %v775_v4 = vld [vmem:[%s2285_s4 + $0x88] sm:$0xff] }
 0x10c   :  { %v896_v22 = vadd.f32 %v832_v49, %v702_v7  ;;  %v928_v23 = vadd.f32 %v864_v50, %v734_v8  ;;  %v428_v24 = vadd.f32 %v1195_v13, %v1640_v15  ;;  %v588_v25 = vadd.f32 %v1243_v16, %v1640_v15  ;;  %v422_v26 = vpop.f32.mrb[11].mxu0  ;;  %v582_v27 = vpop.f32.mrb[11].mxu1  ;;  %v807_v5 = vld [vmem:[%s2285_s4 + $0x188] sm:$0xff]  ;;  %v806_v13 = vld [vmem:[%s2285_s4 + $0x180] sm:$0xff] }
 0x10d   :  { %v895_v30 = vadd.f32 %v831_v55, %v701_v11  ;;  %v927_v31 = vadd.f32 %v863_v56, %v733_v12  ;;  %v423_v32 = vadd.f32 %v1640_v15, %v422_v26  ;;  %v583_v33 = vadd.f32 %v1640_v15, %v582_v27  ;;  %v774_v12 = vld [vmem:[%s2285_s4 + $0x80] sm:$0xff] }
 0x10e   :  { %961 = vst.msk [vmem:[%s2286_s5 + $0x48] sm:$0xff] %vm951_vm1, %v896_v22  ;;  %993 = vst.msk [vmem:[%s2286_s5 + $0x148] sm:$0xff] %vm951_vm1, %v928_v23  ;;  %v704_v34 = vmul.f32 %v1651_v20, %v428_v24  ;;  %v736_v35 = vmul.f32 %v1651_v20, %v588_v25  ;;  %v836_v36 = vmul.f32 %v1635_v14, %v771_v19 }
 0x10f   :  { %v868_v37 = vmul.f32 %v1635_v14, %v803_v21  ;;  %960 = vst.msk [vmem:[%s2286_s5 + $0x40] sm:$0xff] %vm951_vm1, %v895_v30  ;;  %992 = vst.msk [vmem:[%s2286_s5 + $0x140] sm:$0xff] %vm951_vm1, %v927_v31  ;;  %v703_v38 = vmul.f32 %v1651_v20, %v423_v32  ;;  %v735_v39 = vmul.f32 %v1651_v20, %v583_v33  ;;  %v1198_v40 = vpop.f32.mrb[12].mxu0  ;;  %v1246_v41 = vpop.f32.mrb[12].mxu1  ;;  %v777_v31 = vld [vmem:[%s2285_s4 + $0x98] sm:$0xff] }
 0x110   :  { %v835_v42 = vmul.f32 %v1635_v14, %v770_v28  ;;  %v867_v43 = vmul.f32 %v1635_v14, %v802_v29  ;;  %v898_v46 = vadd.f32 %v834_v9, %v704_v34  ;;  %v930_v47 = vadd.f32 %v866_v10, %v736_v35  ;;  %v432_v50 = vpop.f32.mrb[13].mxu0  ;;  %v592_v51 = vpop.f32.mrb[13].mxu1  ;;  %v809_v32 = vld [vmem:[%s2285_s4 + $0x198] sm:$0xff] }
 0x111   :  { %v438_v48 = vadd.f32 %v1198_v40, %v1640_v15  ;;  %v598_v49 = vadd.f32 %v1246_v41, %v1640_v15  ;;  %v897_v54 = vadd.f32 %v833_v17, %v703_v38  ;;  %v929_v55 = vadd.f32 %v865_v18, %v735_v39  ;;  %v776_v39 = vld [vmem:[%s2285_s4 + $0x90] sm:$0xff] }
 0x112   :  { %v433_v56 = vadd.f32 %v1640_v15, %v432_v50  ;;  %v593_v57 = vadd.f32 %v1640_v15, %v592_v51  ;;  %963 = vst.msk [vmem:[%s2286_s5 + $0x58] sm:$0xff] %vm951_vm1, %v898_v46  ;;  %995 = vst.msk [vmem:[%s2286_s5 + $0x158] sm:$0xff] %vm951_vm1, %v930_v47  ;;  %v838_v60 = vmul.f32 %v1635_v14, %v773_v44  ;;  %v808_v40 = vld [vmem:[%s2285_s4 + $0x190] sm:$0xff] }
 0x113   :  { %v706_v58 = vmul.f32 %v1651_v20, %v438_v48  ;;  %v738_v59 = vmul.f32 %v1651_v20, %v598_v49  ;;  %v870_v61 = vmul.f32 %v1635_v14, %v805_v45  ;;  %962 = vst.msk [vmem:[%s2286_s5 + $0x50] sm:$0xff] %vm951_vm1, %v897_v54  ;;  %994 = vst.msk [vmem:[%s2286_s5 + $0x150] sm:$0xff] %vm951_vm1, %v929_v55  ;;  %v1201_v0 = vpop.f32.mrb[14].mxu0  ;;  %v1249_v1 = vpop.f32.mrb[14].mxu1  ;;  %v779_v55 = vld [vmem:[%s2285_s4 + $0xa8] sm:$0xff] }
 0x114   :  { %v705_v62 = vmul.f32 %v1651_v20, %v433_v56  ;;  %v737_v63 = vmul.f32 %v1651_v20, %v593_v57  ;;  %v837_v2 = vmul.f32 %v1635_v14, %v772_v52  ;;  %v869_v3 = vmul.f32 %v1635_v14, %v804_v53  ;;  %v442_v10 = vpop.f32.mrb[15].mxu0  ;;  %v602_v11 = vpop.f32.mrb[15].mxu1  ;;  %v811_v56 = vld [vmem:[%s2285_s4 + $0x1a8] sm:$0xff] }
 0x115   :  { %v900_v6 = vadd.f32 %v836_v36, %v706_v58  ;;  %v932_v7 = vadd.f32 %v868_v37, %v738_v59  ;;  %v448_v8 = vadd.f32 %v1201_v0, %v1640_v15  ;;  %v608_v9 = vadd.f32 %v1249_v1, %v1640_v15  ;;  %v810_v0 = vld [vmem:[%s2285_s4 + $0x1a0] sm:$0xff] }
 0x116   :  { %v899_v16 = vadd.f32 %v835_v42, %v705_v62  ;;  %v931_v17 = vadd.f32 %v867_v43, %v737_v63  ;;  %v443_v18 = vadd.f32 %v1640_v15, %v442_v10  ;;  %v603_v19 = vadd.f32 %v1640_v15, %v602_v11  ;;  %v778_v63 = vld [vmem:[%s2285_s4 + $0xa0] sm:$0xff] }
 0x117   :  { %965 = vst.msk [vmem:[%s2286_s5 + $0x68] sm:$0xff] %vm951_vm1, %v900_v6  ;;  %997 = vst.msk [vmem:[%s2286_s5 + $0x168] sm:$0xff] %vm951_vm1, %v932_v7  ;;  %v708_v21 = vmul.f32 %v1651_v20, %v448_v8  ;;  %v740_v22 = vmul.f32 %v1651_v20, %v608_v9  ;;  %v840_v23 = vmul.f32 %v1635_v14, %v775_v4  ;;  %v1204_v27 = vpop.f32.mrb[16].mxu0  ;;  %v1252_v28 = vpop.f32.mrb[16].mxu1 }
 0x118   :  { %v872_v24 = vmul.f32 %v1635_v14, %v807_v5  ;;  %964 = vst.msk [vmem:[%s2286_s5 + $0x60] sm:$0xff] %vm951_vm1, %v899_v16  ;;  %996 = vst.msk [vmem:[%s2286_s5 + $0x160] sm:$0xff] %vm951_vm1, %v931_v17  ;;  %v707_v25 = vmul.f32 %v1651_v20, %v443_v18  ;;  %v739_v26 = vmul.f32 %v1651_v20, %v603_v19  ;;  %v452_v37 = vpop.f32.mrb[17].mxu0  ;;  %v612_v38 = vpop.f32.mrb[17].mxu1  ;;  %v781_v17 = vld [vmem:[%s2285_s4 + $0xb8] sm:$0xff] }
 0x119   :  { %v839_v29 = vmul.f32 %v1635_v14, %v774_v12  ;;  %v871_v30 = vmul.f32 %v1635_v14, %v806_v13  ;;  %v902_v33 = vadd.f32 %v838_v60, %v708_v21  ;;  %v934_v34 = vadd.f32 %v870_v61, %v740_v22  ;;  %v813_v18 = vld [vmem:[%s2285_s4 + $0x1b8] sm:$0xff] }
 0x11a   :  { %v458_v35 = vadd.f32 %v1204_v27, %v1640_v15  ;;  %v618_v36 = vadd.f32 %v1252_v28, %v1640_v15  ;;  %v901_v41 = vadd.f32 %v837_v2, %v707_v25  ;;  %v933_v42 = vadd.f32 %v869_v3, %v739_v26  ;;  %v780_v26 = vld [vmem:[%s2285_s4 + $0xb0] sm:$0xff] }
 0x11b   :  { %v453_v43 = vadd.f32 %v1640_v15, %v452_v37  ;;  %v613_v44 = vadd.f32 %v1640_v15, %v612_v38  ;;  %967 = vst.msk [vmem:[%s2286_s5 + $0x78] sm:$0xff] %vm951_vm1, %v902_v33  ;;  %999 = vst.msk [vmem:[%s2286_s5 + $0x178] sm:$0xff] %vm951_vm1, %v934_v34  ;;  %v842_v47 = vmul.f32 %v1635_v14, %v777_v31  ;;  %v1207_v51 = vpop.f32.mrb[18].mxu0  ;;  %v1255_v52 = vpop.f32.mrb[18].mxu1  ;;  %v812_v27 = vld [vmem:[%s2285_s4 + $0x1b0] sm:$0xff] }
 0x11c   :  { %v710_v45 = vmul.f32 %v1651_v20, %v458_v35  ;;  %v742_v46 = vmul.f32 %v1651_v20, %v618_v36  ;;  %v874_v48 = vmul.f32 %v1635_v14, %v809_v32  ;;  %966 = vst.msk [vmem:[%s2286_s5 + $0x70] sm:$0xff] %vm951_vm1, %v901_v41  ;;  %998 = vst.msk [vmem:[%s2286_s5 + $0x170] sm:$0xff] %vm951_vm1, %v933_v42  ;;  %v462_v61 = vpop.f32.mrb[19].mxu0  ;;  %v622_v62 = vpop.f32.mrb[19].mxu1  ;;  %v783_v42 = vld [vmem:[%s2285_s4 + $0xc8] sm:$0xff] }
 0x11d   :  { %v709_v49 = vmul.f32 %v1651_v20, %v453_v43  ;;  %v741_v50 = vmul.f32 %v1651_v20, %v613_v44  ;;  %v841_v53 = vmul.f32 %v1635_v14, %v776_v39  ;;  %v873_v54 = vmul.f32 %v1635_v14, %v808_v40  ;;  %v815_v43 = vld [vmem:[%s2285_s4 + $0x1c8] sm:$0xff] }
 0x11e   :  { %v904_v57 = vadd.f32 %v840_v23, %v710_v45  ;;  %v936_v58 = vadd.f32 %v872_v24, %v742_v46  ;;  %v468_v59 = vadd.f32 %v1207_v51, %v1640_v15  ;;  %v628_v60 = vadd.f32 %v1255_v52, %v1640_v15  ;;  %v814_v51 = vld [vmem:[%s2285_s4 + $0x1c0] sm:$0xff] }
 0x11f   :  { %v903_v1 = vadd.f32 %v839_v29, %v709_v49  ;;  %v935_v2 = vadd.f32 %v871_v30, %v741_v50  ;;  %v463_v3 = vadd.f32 %v1640_v15, %v462_v61  ;;  %v623_v4 = vadd.f32 %v1640_v15, %v622_v62  ;;  %v1210_v11 = vpop.f32.mrb[20].mxu0  ;;  %v1258_v12 = vpop.f32.mrb[20].mxu1  ;;  %v782_v50 = vld [vmem:[%s2285_s4 + $0xc0] sm:$0xff] }
 0x120   :  { %969 = vst.msk [vmem:[%s2286_s5 + $0x88] sm:$0xff] %vm951_vm1, %v904_v57  ;;  %1001 = vst.msk [vmem:[%s2286_s5 + $0x188] sm:$0xff] %vm951_vm1, %v936_v58  ;;  %v712_v5 = vmul.f32 %v1651_v20, %v468_v59  ;;  %v744_v6 = vmul.f32 %v1651_v20, %v628_v60  ;;  %v844_v7 = vmul.f32 %v1635_v14, %v779_v55  ;;  %v472_v24 = vpop.f32.mrb[21].mxu0  ;;  %v632_v25 = vpop.f32.mrb[21].mxu1 }
 0x121   :  { %v876_v8 = vmul.f32 %v1635_v14, %v811_v56  ;;  %968 = vst.msk [vmem:[%s2286_s5 + $0x80] sm:$0xff] %vm951_vm1, %v903_v1  ;;  %1000 = vst.msk [vmem:[%s2286_s5 + $0x180] sm:$0xff] %vm951_vm1, %v935_v2  ;;  %v711_v9 = vmul.f32 %v1651_v20, %v463_v3  ;;  %v743_v10 = vmul.f32 %v1651_v20, %v623_v4  ;;  %v785_v2 = vld [vmem:[%s2285_s4 + $0xd8] sm:$0xff] }
 0x122   :  { %v843_v13 = vmul.f32 %v1635_v14, %v778_v63  ;;  %v875_v16 = vmul.f32 %v1635_v14, %v810_v0  ;;  %v906_v19 = vadd.f32 %v842_v47, %v712_v5  ;;  %v938_v21 = vadd.f32 %v874_v48, %v744_v6  ;;  %v817_v3 = vld [vmem:[%s2285_s4 + $0x1d8] sm:$0xff] }
 0x123   :  { %v478_v22 = vadd.f32 %v1210_v11, %v1640_v15  ;;  %v638_v23 = vadd.f32 %v1258_v12, %v1640_v15  ;;  %v905_v28 = vadd.f32 %v841_v53, %v711_v9  ;;  %v937_v29 = vadd.f32 %v873_v54, %v743_v10  ;;  %v1213_v38 = vpop.f32.mrb[22].mxu0  ;;  %v1261_v39 = vpop.f32.mrb[22].mxu1  ;;  %v784_v10 = vld [vmem:[%s2285_s4 + $0xd0] sm:$0xff] }
 0x124   :  { %v473_v30 = vadd.f32 %v1640_v15, %v472_v24  ;;  %v633_v31 = vadd.f32 %v1640_v15, %v632_v25  ;;  %971 = vst.msk [vmem:[%s2286_s5 + $0x98] sm:$0xff] %vm951_vm1, %v906_v19  ;;  %1003 = vst.msk [vmem:[%s2286_s5 + $0x198] sm:$0xff] %vm951_vm1, %v938_v21  ;;  %v846_v34 = vmul.f32 %v1635_v14, %v781_v17  ;;  %v482_v48 = vpop.f32.mrb[23].mxu0  ;;  %v642_v49 = vpop.f32.mrb[23].mxu1  ;;  %v816_v11 = vld [vmem:[%s2285_s4 + $0x1d0] sm:$0xff] }
 0x125   :  { %v714_v32 = vmul.f32 %v1651_v20, %v478_v22  ;;  %v746_v33 = vmul.f32 %v1651_v20, %v638_v23  ;;  %v878_v35 = vmul.f32 %v1635_v14, %v813_v18  ;;  %970 = vst.msk [vmem:[%s2286_s5 + $0x90] sm:$0xff] %vm951_vm1, %v905_v28  ;;  %1002 = vst.msk [vmem:[%s2286_s5 + $0x190] sm:$0xff] %vm951_vm1, %v937_v29  ;;  %v787_v29 = vld [vmem:[%s2285_s4 + $0xe8] sm:$0xff] }
 0x126   :  { %v713_v36 = vmul.f32 %v1651_v20, %v473_v30  ;;  %v745_v37 = vmul.f32 %v1651_v20, %v633_v31  ;;  %v845_v40 = vmul.f32 %v1635_v14, %v780_v26  ;;  %v877_v41 = vmul.f32 %v1635_v14, %v812_v27  ;;  %v819_v30 = vld [vmem:[%s2285_s4 + $0x1e8] sm:$0xff] }
 0x127   :  { %v908_v44 = vadd.f32 %v844_v7, %v714_v32  ;;  %v940_v45 = vadd.f32 %v876_v8, %v746_v33  ;;  %v488_v46 = vadd.f32 %v1213_v38, %v1640_v15  ;;  %v648_v47 = vadd.f32 %v1261_v39, %v1640_v15  ;;  %v1216_v62 = vpop.f32.mrb[24].mxu0  ;;  %v1264_v63 = vpop.f32.mrb[24].mxu1  ;;  %v818_v38 = vld [vmem:[%s2285_s4 + $0x1e0] sm:$0xff] }
 0x128   :  { %v907_v52 = vadd.f32 %v843_v13, %v713_v36  ;;  %v939_v53 = vadd.f32 %v875_v16, %v745_v37  ;;  %v483_v54 = vadd.f32 %v1640_v15, %v482_v48  ;;  %v643_v55 = vadd.f32 %v1640_v15, %v642_v49  ;;  %v492_v8 = vpop.f32.mrb[25].mxu0  ;;  %v652_v9 = vpop.f32.mrb[25].mxu1  ;;  %v786_v37 = vld [vmem:[%s2285_s4 + $0xe0] sm:$0xff] }
 0x129   :  { %973 = vst.msk [vmem:[%s2286_s5 + $0xa8] sm:$0xff] %vm951_vm1, %v908_v44  ;;  %1005 = vst.msk [vmem:[%s2286_s5 + $0x1a8] sm:$0xff] %vm951_vm1, %v940_v45  ;;  %v716_v56 = vmul.f32 %v1651_v20, %v488_v46  ;;  %v748_v57 = vmul.f32 %v1651_v20, %v648_v47  ;;  %v848_v58 = vmul.f32 %v1635_v14, %v783_v42 }
 0x12a   :  { %v880_v59 = vmul.f32 %v1635_v14, %v815_v43  ;;  %972 = vst.msk [vmem:[%s2286_s5 + $0xa0] sm:$0xff] %vm951_vm1, %v907_v52  ;;  %1004 = vst.msk [vmem:[%s2286_s5 + $0x1a0] sm:$0xff] %vm951_vm1, %v939_v53  ;;  %v715_v60 = vmul.f32 %v1651_v20, %v483_v54  ;;  %v747_v61 = vmul.f32 %v1651_v20, %v643_v55  ;;  %v789_v53 = vld [vmem:[%s2285_s4 + $0xf8] sm:$0xff] }
 0x12b   :  { %v847_v0 = vmul.f32 %v1635_v14, %v782_v50  ;;  %v879_v1 = vmul.f32 %v1635_v14, %v814_v51  ;;  %v910_v4 = vadd.f32 %v846_v34, %v716_v56  ;;  %v942_v5 = vadd.f32 %v878_v35, %v748_v57  ;;  %v1219_v25 = vpop.f32.mrb[26].mxu0  ;;  %v1267_v26 = vpop.f32.mrb[26].mxu1  ;;  %v821_v54 = vld [vmem:[%s2285_s4 + $0x1f8] sm:$0xff] }
 0x12c   :  { %v498_v6 = vadd.f32 %v1216_v62, %v1640_v15  ;;  %v658_v7 = vadd.f32 %v1264_v63, %v1640_v15  ;;  %v909_v12 = vadd.f32 %v845_v40, %v715_v60  ;;  %v941_v13 = vadd.f32 %v877_v41, %v747_v61  ;;  %v502_v35 = vpop.f32.mrb[27].mxu0  ;;  %v662_v36 = vpop.f32.mrb[27].mxu1  ;;  %v788_v61 = vld [vmem:[%s2285_s4 + $0xf0] sm:$0xff] }
 0x12d   :  { %v493_v16 = vadd.f32 %v1640_v15, %v492_v8  ;;  %v653_v17 = vadd.f32 %v1640_v15, %v652_v9  ;;  %975 = vst.msk [vmem:[%s2286_s5 + $0xb8] sm:$0xff] %vm951_vm1, %v910_v4  ;;  %1007 = vst.msk [vmem:[%s2286_s5 + $0x1b8] sm:$0xff] %vm951_vm1, %v942_v5  ;;  %v850_v21 = vmul.f32 %v1635_v14, %v785_v2  ;;  %v820_v62 = vld [vmem:[%s2285_s4 + $0x1f0] sm:$0xff] }
 0x12e   :  { %v718_v18 = vmul.f32 %v1651_v20, %v498_v6  ;;  %v750_v19 = vmul.f32 %v1651_v20, %v658_v7  ;;  %v882_v22 = vmul.f32 %v1635_v14, %v817_v3  ;;  %974 = vst.msk [vmem:[%s2286_s5 + $0xb0] sm:$0xff] %vm951_vm1, %v909_v12  ;;  %1006 = vst.msk [vmem:[%s2286_s5 + $0x1b0] sm:$0xff] %vm951_vm1, %v941_v13 }
 0x12f   :  { %v717_v23 = vmul.f32 %v1651_v20, %v493_v16  ;;  %v749_v24 = vmul.f32 %v1651_v20, %v653_v17  ;;  %v849_v27 = vmul.f32 %v1635_v14, %v784_v10  ;;  %v881_v28 = vmul.f32 %v1635_v14, %v816_v11  ;;  %v1222_v49 = vpop.f32.mrb[28].mxu0  ;;  %v1270_v50 = vpop.f32.mrb[28].mxu1 }
 0x130   :  { %v912_v31 = vadd.f32 %v848_v58, %v718_v18  ;;  %v944_v32 = vadd.f32 %v880_v59, %v750_v19  ;;  %v508_v33 = vadd.f32 %v1219_v25, %v1640_v15  ;;  %v668_v34 = vadd.f32 %v1267_v26, %v1640_v15  ;;  %v512_v59 = vpop.f32.mrb[29].mxu0  ;;  %v672_v60 = vpop.f32.mrb[29].mxu1 }
 0x131   :  { %v911_v39 = vadd.f32 %v847_v0, %v717_v23  ;;  %v943_v40 = vadd.f32 %v879_v1, %v749_v24  ;;  %v503_v41 = vadd.f32 %v1640_v15, %v502_v35  ;;  %v663_v42 = vadd.f32 %v1640_v15, %v662_v36 }
 0x132   :  { %977 = vst.msk [vmem:[%s2286_s5 + $0xc8] sm:$0xff] %vm951_vm1, %v912_v31  ;;  %1009 = vst.msk [vmem:[%s2286_s5 + $0x1c8] sm:$0xff] %vm951_vm1, %v944_v32  ;;  %v720_v43 = vmul.f32 %v1651_v20, %v508_v33  ;;  %v752_v44 = vmul.f32 %v1651_v20, %v668_v34  ;;  %v852_v45 = vmul.f32 %v1635_v14, %v787_v29 }
 0x133   :  { %v884_v46 = vmul.f32 %v1635_v14, %v819_v30  ;;  %976 = vst.msk [vmem:[%s2286_s5 + $0xc0] sm:$0xff] %vm951_vm1, %v911_v39  ;;  %1008 = vst.msk [vmem:[%s2286_s5 + $0x1c0] sm:$0xff] %vm951_vm1, %v943_v40  ;;  %v719_v47 = vmul.f32 %v1651_v20, %v503_v41  ;;  %v751_v48 = vmul.f32 %v1651_v20, %v663_v42  ;;  %v1225_v9 = vpop.f32.mrb[30].mxu0  ;;  %v1273_v10 = vpop.f32.mrb[30].mxu1 }
 0x134   :  { %v851_v51 = vmul.f32 %v1635_v14, %v786_v37  ;;  %v883_v52 = vmul.f32 %v1635_v14, %v818_v38  ;;  %v914_v55 = vadd.f32 %v850_v21, %v720_v43  ;;  %v946_v56 = vadd.f32 %v882_v22, %v752_v44  ;;  %v522_v19 = vpop.f32.mrb[31].mxu0  ;;  %v682_v21 = vpop.f32.mrb[31].mxu1 }
 0x135   :  { %v518_v57 = vadd.f32 %v1222_v49, %v1640_v15  ;;  %v678_v58 = vadd.f32 %v1270_v50, %v1640_v15  ;;  %v913_v63 = vadd.f32 %v849_v27, %v719_v47  ;;  %v945_v0 = vadd.f32 %v881_v28, %v751_v48 }
 0x136   :  { %v513_v1 = vadd.f32 %v1640_v15, %v512_v59  ;;  %v673_v2 = vadd.f32 %v1640_v15, %v672_v60  ;;  %979 = vst.msk [vmem:[%s2286_s5 + $0xd8] sm:$0xff] %vm951_vm1, %v914_v55  ;;  %1011 = vst.msk [vmem:[%s2286_s5 + $0x1d8] sm:$0xff] %vm951_vm1, %v946_v56  ;;  %v854_v5 = vmul.f32 %v1635_v14, %v789_v53 }
 0x137   :  { %v722_v3 = vmul.f32 %v1651_v20, %v518_v57  ;;  %v754_v4 = vmul.f32 %v1651_v20, %v678_v58  ;;  %v886_v6 = vmul.f32 %v1635_v14, %v821_v54  ;;  %978 = vst.msk [vmem:[%s2286_s5 + $0xd0] sm:$0xff] %vm951_vm1, %v913_v63  ;;  %1010 = vst.msk [vmem:[%s2286_s5 + $0x1d0] sm:$0xff] %vm951_vm1, %v945_v0 }
 0x138   :  { %v721_v7 = vmul.f32 %v1651_v20, %v513_v1  ;;  %v753_v8 = vmul.f32 %v1651_v20, %v673_v2  ;;  %v853_v11 = vmul.f32 %v1635_v14, %v788_v61  ;;  %v885_v12 = vmul.f32 %v1635_v14, %v820_v62 }
 0x139   :  { %v916_v13 = vadd.f32 %v852_v45, %v722_v3  ;;  %v948_v16 = vadd.f32 %v884_v46, %v754_v4  ;;  %v528_v17 = vadd.f32 %v1225_v9, %v1640_v15  ;;  %v688_v18 = vadd.f32 %v1273_v10, %v1640_v15 }
 0x13a   :  { %v915_v22 = vadd.f32 %v851_v51, %v721_v7  ;;  %v947_v23 = vadd.f32 %v883_v52, %v753_v8  ;;  %v523_v24 = vadd.f32 %v1640_v15, %v522_v19  ;;  %v683_v25 = vadd.f32 %v1640_v15, %v682_v21 }
 0x13b   :  { %981 = vst.msk [vmem:[%s2286_s5 + $0xe8] sm:$0xff] %vm951_vm1, %v916_v13  ;;  %1013 = vst.msk [vmem:[%s2286_s5 + $0x1e8] sm:$0xff] %vm951_vm1, %v948_v16  ;;  %v724_v14 = vmul.f32 %v1651_v20, %v528_v17  ;;  %v756_v26 = vmul.f32 %v1651_v20, %v688_v18 }
 0x13c   :  { %980 = vst.msk [vmem:[%s2286_s5 + $0xe0] sm:$0xff] %vm951_vm1, %v915_v22  ;;  %1012 = vst.msk [vmem:[%s2286_s5 + $0x1e0] sm:$0xff] %vm951_vm1, %v947_v23  ;;  %v723_v15 = vmul.f32 %v1651_v20, %v523_v24  ;;  %v755_v27 = vmul.f32 %v1651_v20, %v683_v25 }
 0x13d   :  { %v918_v28 = vadd.f32 %v854_v5, %v724_v14  ;;  %v950_v29 = vadd.f32 %v886_v6, %v756_v26 }
 0x13e   :  { %v917_v30 = vadd.f32 %v853_v11, %v723_v15  ;;  %v949_v31 = vadd.f32 %v885_v12, %v755_v27 }
 0x13f   :  { %983 = vst.msk [vmem:[%s2286_s5 + $0xf8] sm:$0xff] %vm951_vm1, %v918_v28  ;;  %1015 = vst.msk [vmem:[%s2286_s5 + $0x1f8] sm:$0xff] %vm951_vm1, %v950_v29 }
 0x140   :  { %982 = vst.msk [vmem:[%s2286_s5 + $0xf0] sm:$0xff] %vm951_vm1, %v917_v30  ;;  %1014 = vst.msk [vmem:[%s2286_s5 + $0x1f0] sm:$0xff] %vm951_vm1, %v949_v31 }
 0x141   :  { %1020 = vsyncpa [#allocation3], 1 }

</bundles_post_ra>
